<compile_context>
chip_gen: v7x
topology: tpu7x:2x2x1
jax: 0.10.0
libtpu: 0.0.40
codegen_flags: <defaults>
</compile_context>

<pallas_src>
import numpy as np
import jax
import jax.numpy as jnp
from jax.experimental import pallas as pl
from jax.experimental.pallas import tpu as pltpu

EPS = 1e-5


def _round_up(x, m):
    return ((x + m - 1) // m) * m


def _pick_tile_hw(HW, B, C, target_bytes=2 << 20):
    """Largest multiple-of-128 divisor of HW whose f32 x double-buffer fits the
    target; falls back to the full extent if HW has no 128-multiple divisor."""
    cands = [t for t in range(128, HW + 1, 128) if HW % t == 0]
    if not cands:
        return HW                      # block == full dim (allowed by Mosaic)
    fit = [t for t in cands if 2 * B * C * t * 4 <= target_bytes]
    return max(fit) if fit else min(cands)


def nnclr_forward(x_nchw, params, tile_hw=None):
    """Fused NNCLR forward: backbone -> flatten -> projection -> prediction."""
    B, C, H, W = x_nchw.shape
    HW = H * W
    F = params["w0"].shape[1]
    OD = params["w3"].shape[1]
    PAD = _round_up(OD, 128)                     # lane-dense output width
    if tile_hw is None:
        tile_hw = _pick_tile_hw(HW, B, C)
    assert HW % tile_hw == 0, "spatial tile must divide H*W"
    n_steps = HW // tile_hw
    start_step = max(n_steps - 2, 0)             # late, overlapped weight DMA
    inv_hw = 1.0 / float(HW)

    # Glue only (all free / tiny): native NCHW buffer viewed as (B, C, HW);
    # conv weight transposed to (F, C); conv bias as a (F, 1) column.
    x3 = x_nchw.reshape(B, C, HW)                # f32, no copy, no transpose
    w0t = jnp.transpose(params["w0"])            # (F, C) tiny
    b0c = params["b0"].reshape(F, 1)

    bf = lambda a: a.astype(jnp.bfloat16)
    w_list = [bf(params["w1"]), bf(params["w2"]), bf(params["w3"]),
              bf(params["w4"]), bf(params["w5"])]

    args = (x3, w0t, b0c,
            params["g1"], params["be1"], params["g2"], params["be2"],
            params["g3"], params["be3"], params["g4"], params["be4"],
            params["b5"],
            *w_list)

    def kernel(x_ref, w0t_ref, b0_ref,
               g1, be1, g2, be2, g3, be3, g4, be4, b5,
               w1h, w2h, w3h, w4h, w5h,
               z_ref, p_ref,
               y_acc, w1b, w2b, w3b, w4b, w5b, wsem):
        s = pl.program_id(0)
        w_hbm = (w1h, w2h, w3h, w4h, w5h)
        w_buf = (w1b, w2b, w3b, w4b, w5b)

        @pl.when(s == 0)
        def _init():
            y_acc[...] = jnp.zeros_like(y_acc)

        # Single-buffered head-weight DMA, overlapped with the last pooling
        # steps (the pooling loop is HBM-bound; weights ride the same pipe).
        @pl.when(s == start_step)
        def _start_weight_dma():
            for i in range(5):
                pltpu.make_async_copy(w_hbm[i], w_buf[i], wsem.at[i]).start()

        # ---- backbone tile: 1x1 conv as C broadcast-FMA VPU ops (K=C is far
        #      too small for the MXU), bias + ReLU, then ONE cross-lane (XLU)
        #      reduce into the resident (B, F) f32 accumulator.
        conv = None
        for c in range(C):                                   # static unroll, C small
            xc = x_ref[:, c:c + 1, :]                        # (B, 1, T) f32
            wc = w0t_ref[:, c:c + 1]                         # (F, 1) f32
            term = xc * wc[None, :, :]                       # (B, F, T)
            conv = term if conv is None else conv + term
        h = jnp.maximum(conv + b0_ref[...][None], 0.0)       # (B, F, T)
        y_acc[...] += jnp.sum(h, axis=-1)                    # lane reduce -> (B, F)

        # ---- last step: finish the global average pool and run both heads
        #      fully in VMEM (heads are overhead-bound at M=B: fuse, don't tile).
        @pl.when(s == n_steps - 1)
        def _heads():
            for i in range(5):
                pltpu.make_async_copy(w_hbm[i], w_buf[i], wsem.at[i]).wait()

            y = y_acc[...] * inv_hw                          # (B, F) f32

            def bn(t, g, b):                                 # BatchNorm1d, training mode
                mu = jnp.mean(t, axis=0, keepdims=True)
                var = jnp.mean((t - mu) ** 2, axis=0, keepdims=True)
                return (t - mu) * jax.lax.rsqrt(var + EPS) * g[...] + b[...]

            def mm(a, wb):                                   # bf16 MXU, f32 accumulate
                return jnp.dot(a.astype(jnp.bfloat16), wb[...],
                               preferred_element_type=jnp.float32)

            h1 = jnp.maximum(bn(mm(y, w1b), g1, be1), 0.0)
            h2 = jnp.maximum(bn(mm(h1, w2b), g2, be2), 0.0)
            z = bn(mm(h2, w3b), g3, be3)
            q = jnp.maximum(bn(mm(z, w4b), g4, be4), 0.0)
            p = mm(q, w5b) + b5[...]

            if PAD > OD:                                     # lane-dense (x128) stores
                zeros = jnp.zeros((B, PAD - OD), jnp.float32)
                z = jnp.concatenate([z, zeros], axis=-1)
                p = jnp.concatenate([p, zeros], axis=-1)
            z_ref[...] = z
            p_ref[...] = p

    def full(a):
        n = a.ndim
        return pl.BlockSpec(a.shape, lambda s, n=n: (0,) * n)

    in_specs = ([pl.BlockSpec((B, C, tile_hw), lambda s: (0, 0, s))]   # pipelined x
                + [full(a) for a in args[1:12]]                        # tiny params
                + [pl.BlockSpec(memory_space=pl.ANY)] * 5)             # head weights (HBM)

    scratch = ([pltpu.VMEM((B, F), jnp.float32)]                       # pool accumulator
               + [pltpu.VMEM(w.shape, jnp.bfloat16) for w in w_list]   # single-buffer weights
               + [pltpu.SemaphoreType.DMA((5,))])

    # Explicit scoped-VMEM limit from actual buffer sizes (+ headroom),
    # generation-safe (<= 48 MiB so it also fits v7x's 64 MiB physical VMEM).
    est = (2 * B * C * tile_hw * 4                                     # x double buffer
           + B * F * 4                                                 # y_acc
           + sum(int(np.prod(w.shape)) * 2 for w in w_list)            # weight scratch
           + 2 * 2 * B * PAD * 4                                       # z, p outputs
           + 2 * sum(int(np.prod(a.shape)) * 4 for a in args[1:12]))   # small params
    vmem_limit = int(min(max(2 * est + (8 << 20), 32 << 20), 48 << 20))

    z_pad, p_pad = pl.pallas_call(
        kernel,
        out_shape=(jax.ShapeDtypeStruct((B, PAD), jnp.float32),
                   jax.ShapeDtypeStruct((B, PAD), jnp.float32)),
        grid_spec=pltpu.PrefetchScalarGridSpec(
            num_scalar_prefetch=0,
            grid=(n_steps,),
            in_specs=in_specs,
            out_specs=(pl.BlockSpec((B, PAD), lambda s: (0, 0)),
                       pl.BlockSpec((B, PAD), lambda s: (0, 0))),
            scratch_shapes=scratch),
        compiler_params=pltpu.CompilerParams(
            # single grid axis is the pooling reduction -> must be arbitrary
            dimension_semantics=("arbitrary",),
            vmem_limit_bytes=vmem_limit),
    )(*args)

    # z corresponds to z.detach() in torch (no autograd semantics here).
    return z_pad[:, :OD], p_pad[:, :OD]


def nnclr_reference(x_nchw, params):
    """Pure-JAX reference mirroring the kernel's math (f32 backbone, bf16 heads)."""
    B, C, H, W = x_nchw.shape
    x = x_nchw.reshape(B, C, H * W)
    conv = jnp.einsum("bct,cf->bft", x, params["w0"],
                      precision=jax.lax.Precision.HIGHEST)
    h = jnp.maximum(conv + params["b0"].reshape(1, -1, 1), 0.0)
    y = jnp.mean(h, axis=-1)                                  # (B, F)

    def bn(t, g, b):
        mu = t.mean(0, keepdims=True)
        var = ((t - mu) ** 2).mean(0, keepdims=True)
        return (t - mu) * jax.lax.rsqrt(var + EPS) * g + b

    def mm(a, w):
        return jnp.dot(a.astype(jnp.bfloat16), w.astype(jnp.bfloat16),
                       preferred_element_type=jnp.float32)

    h1 = jnp.maximum(bn(mm(y, params["w1"]), params["g1"], params["be1"]), 0.0)
    h2 = jnp.maximum(bn(mm(h1, params["w2"]), params["g2"], params["be2"]), 0.0)
    z = bn(mm(h2, params["w3"]), params["g3"], params["be3"])
    q = jnp.maximum(bn(mm(z, params["w4"]), params["g4"], params["be4"]), 0.0)
    p = mm(q, params["w5"]) + params["b5"]
    return z, p


def init_params(key, C, num_ftrs, proj_hidden, pred_hidden, out_dim):
    keys = jax.random.split(key, 8)

    def lin(k, fan_in, fan_out):
        bound = 1.0 / np.sqrt(fan_in)
        return jax.random.uniform(k, (fan_in, fan_out), jnp.float32, -bound, bound)

    params = {}
    # synthetic backbone: 1x1 conv weight (C, F) + bias
    params["w0"] = lin(keys[0], C, num_ftrs)
    params["b0"] = jax.random.uniform(keys[1], (1, num_ftrs), jnp.float32,
                                      -1.0 / np.sqrt(C), 1.0 / np.sqrt(C))
    # projection head: (Linear no-bias -> BN -> ReLU) x2 -> Linear no-bias -> BN
    params["w1"] = lin(keys[2], num_ftrs, proj_hidden)
    params["g1"] = jnp.ones((1, proj_hidden), jnp.float32)
    params["be1"] = jnp.zeros((1, proj_hidden), jnp.float32)
    params["w2"] = lin(keys[3], proj_hidden, proj_hidden)
    params["g2"] = jnp.ones((1, proj_hidden), jnp.float32)
    params["be2"] = jnp.zeros((1, proj_hidden), jnp.float32)
    params["w3"] = lin(keys[4], proj_hidden, out_dim)
    params["g3"] = jnp.ones((1, out_dim), jnp.float32)
    params["be3"] = jnp.zeros((1, out_dim), jnp.float32)
    # prediction head: Linear no-bias -> BN -> ReLU -> Linear(bias)
    params["w4"] = lin(keys[5], out_dim, pred_hidden)
    params["g4"] = jnp.ones((1, pred_hidden), jnp.float32)
    params["be4"] = jnp.zeros((1, pred_hidden), jnp.float32)
    params["w5"] = lin(keys[6], pred_hidden, out_dim)
    params["b5"] = jax.random.uniform(keys[7], (1, out_dim), jnp.float32,
                                      -1.0 / np.sqrt(pred_hidden),
                                      1.0 / np.sqrt(pred_hidden))
    return params


if __name__ == "__main__":
    # Small shapes consistent with the module (scaled-down num_ftrs/out_dim).
    B, C, H, W = 2, 4, 16, 16
    num_ftrs, proj_hidden, pred_hidden, out_dim = 32, 32, 32, 16

    key = jax.random.PRNGKey(0)
    kx, kp = jax.random.split(key)
    x = jax.random.normal(kx, (B, C, H, W), jnp.float32)
    params = init_params(kp, C, num_ftrs, proj_hidden, pred_hidden, out_dim)

    z_ref, p_ref = nnclr_reference(x, params)

    # Default (budget-picked) tile -> single pooling step; forced 128 tile ->
    # multi-step path exercising the accumulator and cross-step weight DMA.
    for thw in (None, 128):
        z, p = nnclr_forward(x, params, tile_hw=thw)
        z, p = jax.block_until_ready((z, p))
        assert z.shape == (B, out_dim) and p.shape == (B, out_dim)
        assert jnp.allclose(z, z_ref, atol=3e-3, rtol=3e-3), \
            float(jnp.max(jnp.abs(z - z_ref)))
        assert jnp.allclose(p, p_ref, atol=3e-3, rtol=3e-3), \
            float(jnp.max(jnp.abs(p - p_ref)))

    print("KERNEL_OK")
</pallas_src>

<mosaic_0001>
module attributes {stable_mosaic.version = 11 : i64} {
  func.func @kernel(%arg0: i32, %arg1: memref<2x4x256xf32, #tpu.memory_space<vmem>>, %arg2: memref<32x4xf32, #tpu.memory_space<vmem>>, %arg3: memref<32x1xf32, #tpu.memory_space<vmem>>, %arg4: memref<1x32xf32, #tpu.memory_space<vmem>>, %arg5: memref<1x32xf32, #tpu.memory_space<vmem>>, %arg6: memref<1x32xf32, #tpu.memory_space<vmem>>, %arg7: memref<1x32xf32, #tpu.memory_space<vmem>>, %arg8: memref<1x16xf32, #tpu.memory_space<vmem>>, %arg9: memref<1x16xf32, #tpu.memory_space<vmem>>, %arg10: memref<1x32xf32, #tpu.memory_space<vmem>>, %arg11: memref<1x32xf32, #tpu.memory_space<vmem>>, %arg12: memref<1x16xf32, #tpu.memory_space<vmem>>, %arg13: memref<32x32xbf16, #tpu.memory_space<any>>, %arg14: memref<32x32xbf16, #tpu.memory_space<any>>, %arg15: memref<32x16xbf16, #tpu.memory_space<any>>, %arg16: memref<16x32xbf16, #tpu.memory_space<any>>, %arg17: memref<32x16xbf16, #tpu.memory_space<any>>, %arg18: memref<2x128xf32, #tpu.memory_space<vmem>>, %arg19: memref<2x128xf32, #tpu.memory_space<vmem>>, %arg20: memref<2x32xf32, #tpu.memory_space<vmem>>, %arg21: memref<32x32xbf16, #tpu.memory_space<vmem>>, %arg22: memref<32x32xbf16, #tpu.memory_space<vmem>>, %arg23: memref<32x16xbf16, #tpu.memory_space<vmem>>, %arg24: memref<16x32xbf16, #tpu.memory_space<vmem>>, %arg25: memref<32x16xbf16, #tpu.memory_space<vmem>>, %arg26: memref<5x!tpu.dma_semaphore, #tpu.memory_space<semaphore_mem>>) attributes {dimension_semantics = [#tpu.dimension_semantics<arbitrary>], iteration_bounds = array<i64: 1>, scalar_prefetch = 0 : i64, scratch_operands = 7 : i64, tpu.core_type = #tpu.core_type<tc>, window_params = [{transform_indices = @transform_0, window_bounds = array<i64: 2, 4, 256>}, {pipeline_mode = #tpu.pipeline_mode<synchronous>, transform_indices = @transform_1, window_bounds = array<i64: 32, 4>}, {pipeline_mode = #tpu.pipeline_mode<synchronous>, transform_indices = @transform_2, window_bounds = array<i64: 32, 1>}, {pipeline_mode = #tpu.pipeline_mode<synchronous>, transform_indices = @transform_3, window_bounds = array<i64: 1, 32>}, {pipeline_mode = #tpu.pipeline_mode<synchronous>, transform_indices = @transform_4, window_bounds = array<i64: 1, 32>}, {pipeline_mode = #tpu.pipeline_mode<synchronous>, transform_indices = @transform_5, window_bounds = array<i64: 1, 32>}, {pipeline_mode = #tpu.pipeline_mode<synchronous>, transform_indices = @transform_6, window_bounds = array<i64: 1, 32>}, {pipeline_mode = #tpu.pipeline_mode<synchronous>, transform_indices = @transform_7, window_bounds = array<i64: 1, 16>}, {pipeline_mode = #tpu.pipeline_mode<synchronous>, transform_indices = @transform_8, window_bounds = array<i64: 1, 16>}, {pipeline_mode = #tpu.pipeline_mode<synchronous>, transform_indices = @transform_9, window_bounds = array<i64: 1, 32>}, {pipeline_mode = #tpu.pipeline_mode<synchronous>, transform_indices = @transform_10, window_bounds = array<i64: 1, 32>}, {pipeline_mode = #tpu.pipeline_mode<synchronous>, transform_indices = @transform_11, window_bounds = array<i64: 1, 16>}, {}, {}, {}, {}, {}, {pipeline_mode = #tpu.pipeline_mode<synchronous>, transform_indices = @transform_17, window_bounds = array<i64: 2, 128>}, {pipeline_mode = #tpu.pipeline_mode<synchronous>, transform_indices = @transform_18, window_bounds = array<i64: 2, 128>}]} {
    %c0_i32 = arith.constant 0 : i32
    %0 = arith.cmpi eq, %arg0, %c0_i32 : i32
    %1 = arith.extui %0 : i1 to i32
    %c0_i32_0 = arith.constant 0 : i32
    %2 = arith.cmpi ne, %1, %c0_i32_0 : i32
    scf.if %2 {
      %cst_28 = arith.constant 0.000000e+00 : f32
      %46 = vector.broadcast %cst_28 : f32 to vector<2x32xf32>
      %c0_29 = arith.constant 0 : index
      %c0_30 = arith.constant 0 : index
      %47 = vector.load %arg20[%c0_29, %c0_30] : memref<2x32xf32, #tpu.memory_space<vmem>>, vector<2x32xf32>
      tpu.vector_store %arg20[%c0_29, %c0_30], %46 {strides = array<i32>} : memref<2x32xf32, #tpu.memory_space<vmem>>, vector<2x32xf32>,
    } else {
    }
    %c0_i32_1 = arith.constant 0 : i32
    %3 = arith.cmpi eq, %arg0, %c0_i32_1 : i32
    %4 = arith.extui %3 : i1 to i32
    %c0_i32_2 = arith.constant 0 : i32
    %5 = arith.cmpi ne, %4, %c0_i32_2 : i32
    scf.if %5 {
      %c0_i32_28 = arith.constant 0 : i32
      %46 = tpu.memref_slice %arg26[%c0_i32_28] : memref<5x!tpu.dma_semaphore, #tpu.memory_space<semaphore_mem>> -> memref<1x!tpu.dma_semaphore, #tpu.memory_space<semaphore_mem>>
      %47 = tpu.memref_squeeze %46 : memref<1x!tpu.dma_semaphore, #tpu.memory_space<semaphore_mem>> -> memref<!tpu.dma_semaphore, #tpu.memory_space<semaphore_mem>>
      tpu.enqueue_dma source(%arg13 : memref<32x32xbf16, #tpu.memory_space<any>>) target(%arg21 : memref<32x32xbf16, #tpu.memory_space<vmem>>) target_semaphore(%47 : memref<!tpu.dma_semaphore, #tpu.memory_space<semaphore_mem>>)
      %c1_i32 = arith.constant 1 : i32
      %48 = tpu.memref_slice %arg26[%c1_i32] : memref<5x!tpu.dma_semaphore, #tpu.memory_space<semaphore_mem>> -> memref<1x!tpu.dma_semaphore, #tpu.memory_space<semaphore_mem>>
      %49 = tpu.memref_squeeze %48 : memref<1x!tpu.dma_semaphore, #tpu.memory_space<semaphore_mem>> -> memref<!tpu.dma_semaphore, #tpu.memory_space<semaphore_mem>>
      tpu.enqueue_dma source(%arg14 : memref<32x32xbf16, #tpu.memory_space<any>>) target(%arg22 : memref<32x32xbf16, #tpu.memory_space<vmem>>) target_semaphore(%49 : memref<!tpu.dma_semaphore, #tpu.memory_space<semaphore_mem>>)
      %c2_i32 = arith.constant 2 : i32
      %50 = tpu.memref_slice %arg26[%c2_i32] : memref<5x!tpu.dma_semaphore, #tpu.memory_space<semaphore_mem>> -> memref<1x!tpu.dma_semaphore, #tpu.memory_space<semaphore_mem>>
      %51 = tpu.memref_squeeze %50 : memref<1x!tpu.dma_semaphore, #tpu.memory_space<semaphore_mem>> -> memref<!tpu.dma_semaphore, #tpu.memory_space<semaphore_mem>>
      tpu.enqueue_dma source(%arg15 : memref<32x16xbf16, #tpu.memory_space<any>>) target(%arg23 : memref<32x16xbf16, #tpu.memory_space<vmem>>) target_semaphore(%51 : memref<!tpu.dma_semaphore, #tpu.memory_space<semaphore_mem>>)
      %c3_i32 = arith.constant 3 : i32
      %52 = tpu.memref_slice %arg26[%c3_i32] : memref<5x!tpu.dma_semaphore, #tpu.memory_space<semaphore_mem>> -> memref<1x!tpu.dma_semaphore, #tpu.memory_space<semaphore_mem>>
      %53 = tpu.memref_squeeze %52 : memref<1x!tpu.dma_semaphore, #tpu.memory_space<semaphore_mem>> -> memref<!tpu.dma_semaphore, #tpu.memory_space<semaphore_mem>>
      tpu.enqueue_dma source(%arg16 : memref<16x32xbf16, #tpu.memory_space<any>>) target(%arg24 : memref<16x32xbf16, #tpu.memory_space<vmem>>) target_semaphore(%53 : memref<!tpu.dma_semaphore, #tpu.memory_space<semaphore_mem>>)
      %c4_i32 = arith.constant 4 : i32
      %54 = tpu.memref_slice %arg26[%c4_i32] : memref<5x!tpu.dma_semaphore, #tpu.memory_space<semaphore_mem>> -> memref<1x!tpu.dma_semaphore, #tpu.memory_space<semaphore_mem>>
      %55 = tpu.memref_squeeze %54 : memref<1x!tpu.dma_semaphore, #tpu.memory_space<semaphore_mem>> -> memref<!tpu.dma_semaphore, #tpu.memory_space<semaphore_mem>>
      tpu.enqueue_dma source(%arg17 : memref<32x16xbf16, #tpu.memory_space<any>>) target(%arg25 : memref<32x16xbf16, #tpu.memory_space<vmem>>) target_semaphore(%55 : memref<!tpu.dma_semaphore, #tpu.memory_space<semaphore_mem>>)
    } else {
    }
    %c0 = arith.constant 0 : index
    %c0_3 = arith.constant 0 : index
    %c0_4 = arith.constant 0 : index
    %6 = vector.load %arg1[%c0, %c0_3, %c0_4] : memref<2x4x256xf32, #tpu.memory_space<vmem>>, vector<2x1x256xf32>
    %c0_5 = arith.constant 0 : index
    %c0_6 = arith.constant 0 : index
    %7 = vector.load %arg2[%c0_5, %c0_6] : memref<32x4xf32, #tpu.memory_space<vmem>>, vector<32x1xf32>
    %8 = vector.shape_cast %7 : vector<32x1xf32> to vector<1x32x1xf32>
    %9 = vector.broadcast %6 : vector<2x1x256xf32> to vector<2x32x256xf32>
    %10 = vector.broadcast %8 : vector<1x32x1xf32> to vector<2x32x256xf32>
    %11 = arith.mulf %9, %10 : vector<2x32x256xf32>
    %c0_7 = arith.constant 0 : index
    %c1 = arith.constant 1 : index
    %c0_8 = arith.constant 0 : index
    %12 = vector.load %arg1[%c0_7, %c1, %c0_8] : memref<2x4x256xf32, #tpu.memory_space<vmem>>, vector<2x1x256xf32>
    %c0_9 = arith.constant 0 : index
    %c1_10 = arith.constant 1 : index
    %13 = vector.load %arg2[%c0_9, %c1_10] : memref<32x4xf32, #tpu.memory_space<vmem>>, vector<32x1xf32>
    %14 = vector.shape_cast %13 : vector<32x1xf32> to vector<1x32x1xf32>
    %15 = vector.broadcast %12 : vector<2x1x256xf32> to vector<2x32x256xf32>
    %16 = vector.broadcast %14 : vector<1x32x1xf32> to vector<2x32x256xf32>
    %17 = arith.mulf %15, %16 : vector<2x32x256xf32>
    %18 = arith.addf %11, %17 : vector<2x32x256xf32>
    %c0_11 = arith.constant 0 : index
    %c2 = arith.constant 2 : index
    %c0_12 = arith.constant 0 : index
    %19 = vector.load %arg1[%c0_11, %c2, %c0_12] : memref<2x4x256xf32, #tpu.memory_space<vmem>>, vector<2x1x256xf32>
    %c0_13 = arith.constant 0 : index
    %c2_14 = arith.constant 2 : index
    %20 = vector.load %arg2[%c0_13, %c2_14] : memref<32x4xf32, #tpu.memory_space<vmem>>, vector<32x1xf32>
    %21 = vector.shape_cast %20 : vector<32x1xf32> to vector<1x32x1xf32>
    %22 = vector.broadcast %19 : vector<2x1x256xf32> to vector<2x32x256xf32>
    %23 = vector.broadcast %21 : vector<1x32x1xf32> to vector<2x32x256xf32>
    %24 = arith.mulf %22, %23 : vector<2x32x256xf32>
    %25 = arith.addf %18, %24 : vector<2x32x256xf32>
    %c0_15 = arith.constant 0 : index
    %c3 = arith.constant 3 : index
    %c0_16 = arith.constant 0 : index
    %26 = vector.load %arg1[%c0_15, %c3, %c0_16] : memref<2x4x256xf32, #tpu.memory_space<vmem>>, vector<2x1x256xf32>
    %c0_17 = arith.constant 0 : index
    %c3_18 = arith.constant 3 : index
    %27 = vector.load %arg2[%c0_17, %c3_18] : memref<32x4xf32, #tpu.memory_space<vmem>>, vector<32x1xf32>
    %28 = vector.shape_cast %27 : vector<32x1xf32> to vector<1x32x1xf32>
    %29 = vector.broadcast %26 : vector<2x1x256xf32> to vector<2x32x256xf32>
    %30 = vector.broadcast %28 : vector<1x32x1xf32> to vector<2x32x256xf32>
    %31 = arith.mulf %29, %30 : vector<2x32x256xf32>
    %32 = arith.addf %25, %31 : vector<2x32x256xf32>
    %c0_19 = arith.constant 0 : index
    %c0_20 = arith.constant 0 : index
    %33 = vector.load %arg3[%c0_19, %c0_20] : memref<32x1xf32, #tpu.memory_space<vmem>>, vector<32x1xf32>
    %34 = vector.shape_cast %33 : vector<32x1xf32> to vector<1x32x1xf32>
    %35 = vector.broadcast %34 : vector<1x32x1xf32> to vector<2x32x256xf32>
    %36 = arith.addf %32, %35 : vector<2x32x256xf32>
    %cst = arith.constant 0.000000e+00 : f32
    %37 = vector.broadcast %cst : f32 to vector<2x32x256xf32>
    %38 = arith.maximumf %36, %37 : vector<2x32x256xf32>
    %c0_21 = arith.constant 0 : index
    %c0_22 = arith.constant 0 : index
    %39 = vector.load %arg20[%c0_21, %c0_22] : memref<2x32xf32, #tpu.memory_space<vmem>>, vector<2x32xf32>
    %cst_23 = arith.constant dense<0.000000e+00> : vector<2x32xf32>
    %40 = vector.multi_reduction <add>, %38, %cst_23 [2] : vector<2x32x256xf32> to vector<2x32xf32>
    %41 = arith.addf %39, %40 : vector<2x32xf32>
    %c0_24 = arith.constant 0 : index
    %c0_25 = arith.constant 0 : index
    %42 = vector.load %arg20[%c0_24, %c0_25] : memref<2x32xf32, #tpu.memory_space<vmem>>, vector<2x32xf32>
    tpu.vector_store %arg20[%c0_24, %c0_25], %41 {strides = array<i32>} : memref<2x32xf32, #tpu.memory_space<vmem>>, vector<2x32xf32>,
    %c0_i32_26 = arith.constant 0 : i32
    %43 = arith.cmpi eq, %arg0, %c0_i32_26 : i32
    %44 = arith.extui %43 : i1 to i32
    %c0_i32_27 = arith.constant 0 : i32
    %45 = arith.cmpi ne, %44, %c0_i32_27 : i32
    scf.if %45 {
      %c0_i32_28 = arith.constant 0 : i32
      %46 = tpu.memref_slice %arg26[%c0_i32_28] : memref<5x!tpu.dma_semaphore, #tpu.memory_space<semaphore_mem>> -> memref<1x!tpu.dma_semaphore, #tpu.memory_space<semaphore_mem>>
      %47 = tpu.memref_squeeze %46 : memref<1x!tpu.dma_semaphore, #tpu.memory_space<semaphore_mem>> -> memref<!tpu.dma_semaphore, #tpu.memory_space<semaphore_mem>>
      tpu.wait_dma2 semaphore(%47 : memref<!tpu.dma_semaphore, #tpu.memory_space<semaphore_mem>>) src(%arg13 : memref<32x32xbf16, #tpu.memory_space<any>>) dst(%arg21 : memref<32x32xbf16, #tpu.memory_space<vmem>>)
      %c1_i32 = arith.constant 1 : i32
      %48 = tpu.memref_slice %arg26[%c1_i32] : memref<5x!tpu.dma_semaphore, #tpu.memory_space<semaphore_mem>> -> memref<1x!tpu.dma_semaphore, #tpu.memory_space<semaphore_mem>>
      %49 = tpu.memref_squeeze %48 : memref<1x!tpu.dma_semaphore, #tpu.memory_space<semaphore_mem>> -> memref<!tpu.dma_semaphore, #tpu.memory_space<semaphore_mem>>
      tpu.wait_dma2 semaphore(%49 : memref<!tpu.dma_semaphore, #tpu.memory_space<semaphore_mem>>) src(%arg14 : memref<32x32xbf16, #tpu.memory_space<any>>) dst(%arg22 : memref<32x32xbf16, #tpu.memory_space<vmem>>)
      %c2_i32 = arith.constant 2 : i32
      %50 = tpu.memref_slice %arg26[%c2_i32] : memref<5x!tpu.dma_semaphore, #tpu.memory_space<semaphore_mem>> -> memref<1x!tpu.dma_semaphore, #tpu.memory_space<semaphore_mem>>
      %51 = tpu.memref_squeeze %50 : memref<1x!tpu.dma_semaphore, #tpu.memory_space<semaphore_mem>> -> memref<!tpu.dma_semaphore, #tpu.memory_space<semaphore_mem>>
      tpu.wait_dma2 semaphore(%51 : memref<!tpu.dma_semaphore, #tpu.memory_space<semaphore_mem>>) src(%arg15 : memref<32x16xbf16, #tpu.memory_space<any>>) dst(%arg23 : memref<32x16xbf16, #tpu.memory_space<vmem>>)
      %c3_i32 = arith.constant 3 : i32
      %52 = tpu.memref_slice %arg26[%c3_i32] : memref<5x!tpu.dma_semaphore, #tpu.memory_space<semaphore_mem>> -> memref<1x!tpu.dma_semaphore, #tpu.memory_space<semaphore_mem>>
      %53 = tpu.memref_squeeze %52 : memref<1x!tpu.dma_semaphore, #tpu.memory_space<semaphore_mem>> -> memref<!tpu.dma_semaphore, #tpu.memory_space<semaphore_mem>>
      tpu.wait_dma2 semaphore(%53 : memref<!tpu.dma_semaphore, #tpu.memory_space<semaphore_mem>>) src(%arg16 : memref<16x32xbf16, #tpu.memory_space<any>>) dst(%arg24 : memref<16x32xbf16, #tpu.memory_space<vmem>>)
      %c4_i32 = arith.constant 4 : i32
      %54 = tpu.memref_slice %arg26[%c4_i32] : memref<5x!tpu.dma_semaphore, #tpu.memory_space<semaphore_mem>> -> memref<1x!tpu.dma_semaphore, #tpu.memory_space<semaphore_mem>>
      %55 = tpu.memref_squeeze %54 : memref<1x!tpu.dma_semaphore, #tpu.memory_space<semaphore_mem>> -> memref<!tpu.dma_semaphore, #tpu.memory_space<semaphore_mem>>
      tpu.wait_dma2 semaphore(%55 : memref<!tpu.dma_semaphore, #tpu.memory_space<semaphore_mem>>) src(%arg17 : memref<32x16xbf16, #tpu.memory_space<any>>) dst(%arg25 : memref<32x16xbf16, #tpu.memory_space<vmem>>)
      %c0_29 = arith.constant 0 : index
      %c0_30 = arith.constant 0 : index
      %56 = vector.load %arg20[%c0_29, %c0_30] : memref<2x32xf32, #tpu.memory_space<vmem>>, vector<2x32xf32>
      %cst_31 = arith.constant 3.906250e-03 : f32
      %57 = vector.broadcast %cst_31 : f32 to vector<2x32xf32>
      %58 = arith.mulf %56, %57 : vector<2x32xf32>
      %59 = arith.truncf %58 : vector<2x32xf32> to vector<2x32xbf16>
      %c0_32 = arith.constant 0 : index
      %c0_33 = arith.constant 0 : index
      %60 = vector.load %arg21[%c0_32, %c0_33] : memref<32x32xbf16, #tpu.memory_space<vmem>>, vector<32x32xbf16>
      %cst_34 = arith.constant dense<0.000000e+00> : vector<2x32xf32>
      %61 = tpu.matmul %59, %60, %cst_34 {dimension_numbers = #tpu.dot_dimension_numbers<[1], [0], [0], [1], [0, 0, 1, 1], [], []>} : vector<2x32xbf16>, vector<32x32xbf16>, vector<2x32xf32> -> vector<2x32xf32>
      %cst_35 = arith.constant dense<0.000000e+00> : vector<32xf32>
      %62 = vector.multi_reduction <add>, %61, %cst_35 [0] : vector<2x32xf32> to vector<32xf32>
      %63 = vector.shape_cast %62 : vector<32xf32> to vector<1x32xf32>
      %cst_36 = arith.constant 2.000000e+00 : f32
      %64 = vector.broadcast %cst_36 : f32 to vector<1x32xf32>
      %65 = arith.divf %63, %64 : vector<1x32xf32>
      %66 = vector.broadcast %65 : vector<1x32xf32> to vector<2x32xf32>
      %67 = arith.subf %61, %66 : vector<2x32xf32>
      %68 = arith.mulf %67, %67 : vector<2x32xf32>
      %cst_37 = arith.constant dense<0.000000e+00> : vector<32xf32>
      %69 = vector.multi_reduction <add>, %68, %cst_37 [0] : vector<2x32xf32> to vector<32xf32>
      %70 = vector.shape_cast %69 : vector<32xf32> to vector<1x32xf32>
      %cst_38 = arith.constant 2.000000e+00 : f32
      %71 = vector.broadcast %cst_38 : f32 to vector<1x32xf32>
      %72 = arith.divf %70, %71 : vector<1x32xf32>
      %73 = vector.broadcast %65 : vector<1x32xf32> to vector<2x32xf32>
      %74 = arith.subf %61, %73 : vector<2x32xf32>
      %cst_39 = arith.constant 9.99999974E-6 : f32
      %75 = vector.broadcast %cst_39 : f32 to vector<1x32xf32>
      %76 = arith.addf %72, %75 : vector<1x32xf32>
      %77 = math.rsqrt %76 : vector<1x32xf32>
      %78 = vector.broadcast %77 : vector<1x32xf32> to vector<2x32xf32>
      %79 = arith.mulf %74, %78 : vector<2x32xf32>
      %c0_40 = arith.constant 0 : index
      %c0_41 = arith.constant 0 : index
      %80 = vector.load %arg4[%c0_40, %c0_41] : memref<1x32xf32, #tpu.memory_space<vmem>>, vector<1x32xf32>
      %81 = vector.broadcast %80 : vector<1x32xf32> to vector<2x32xf32>
      %82 = arith.mulf %79, %81 : vector<2x32xf32>
      %c0_42 = arith.constant 0 : index
      %c0_43 = arith.constant 0 : index
      %83 = vector.load %arg5[%c0_42, %c0_43] : memref<1x32xf32, #tpu.memory_space<vmem>>, vector<1x32xf32>
      %84 = vector.broadcast %83 : vector<1x32xf32> to vector<2x32xf32>
      %85 = arith.addf %82, %84 : vector<2x32xf32>
      %cst_44 = arith.constant 0.000000e+00 : f32
      %86 = vector.broadcast %cst_44 : f32 to vector<2x32xf32>
      %87 = arith.maximumf %85, %86 : vector<2x32xf32>
      %88 = arith.truncf %87 : vector<2x32xf32> to vector<2x32xbf16>
      %c0_45 = arith.constant 0 : index
      %c0_46 = arith.constant 0 : index
      %89 = vector.load %arg22[%c0_45, %c0_46] : memref<32x32xbf16, #tpu.memory_space<vmem>>, vector<32x32xbf16>
      %cst_47 = arith.constant dense<0.000000e+00> : vector<2x32xf32>
      %90 = tpu.matmul %88, %89, %cst_47 {dimension_numbers = #tpu.dot_dimension_numbers<[1], [0], [0], [1], [0, 0, 1, 1], [], []>} : vector<2x32xbf16>, vector<32x32xbf16>, vector<2x32xf32> -> vector<2x32xf32>
      %cst_48 = arith.constant dense<0.000000e+00> : vector<32xf32>
      %91 = vector.multi_reduction <add>, %90, %cst_48 [0] : vector<2x32xf32> to vector<32xf32>
      %92 = vector.shape_cast %91 : vector<32xf32> to vector<1x32xf32>
      %cst_49 = arith.constant 2.000000e+00 : f32
      %93 = vector.broadcast %cst_49 : f32 to vector<1x32xf32>
      %94 = arith.divf %92, %93 : vector<1x32xf32>
      %95 = vector.broadcast %94 : vector<1x32xf32> to vector<2x32xf32>
      %96 = arith.subf %90, %95 : vector<2x32xf32>
      %97 = arith.mulf %96, %96 : vector<2x32xf32>
      %cst_50 = arith.constant dense<0.000000e+00> : vector<32xf32>
      %98 = vector.multi_reduction <add>, %97, %cst_50 [0] : vector<2x32xf32> to vector<32xf32>
      %99 = vector.shape_cast %98 : vector<32xf32> to vector<1x32xf32>
      %cst_51 = arith.constant 2.000000e+00 : f32
      %100 = vector.broadcast %cst_51 : f32 to vector<1x32xf32>
      %101 = arith.divf %99, %100 : vector<1x32xf32>
      %102 = vector.broadcast %94 : vector<1x32xf32> to vector<2x32xf32>
      %103 = arith.subf %90, %102 : vector<2x32xf32>
      %cst_52 = arith.constant 9.99999974E-6 : f32
      %104 = vector.broadcast %cst_52 : f32 to vector<1x32xf32>
      %105 = arith.addf %101, %104 : vector<1x32xf32>
      %106 = math.rsqrt %105 : vector<1x32xf32>
      %107 = vector.broadcast %106 : vector<1x32xf32> to vector<2x32xf32>
      %108 = arith.mulf %103, %107 : vector<2x32xf32>
      %c0_53 = arith.constant 0 : index
      %c0_54 = arith.constant 0 : index
      %109 = vector.load %arg6[%c0_53, %c0_54] : memref<1x32xf32, #tpu.memory_space<vmem>>, vector<1x32xf32>
      %110 = vector.broadcast %109 : vector<1x32xf32> to vector<2x32xf32>
      %111 = arith.mulf %108, %110 : vector<2x32xf32>
      %c0_55 = arith.constant 0 : index
      %c0_56 = arith.constant 0 : index
      %112 = vector.load %arg7[%c0_55, %c0_56] : memref<1x32xf32, #tpu.memory_space<vmem>>, vector<1x32xf32>
      %113 = vector.broadcast %112 : vector<1x32xf32> to vector<2x32xf32>
      %114 = arith.addf %111, %113 : vector<2x32xf32>
      %cst_57 = arith.constant 0.000000e+00 : f32
      %115 = vector.broadcast %cst_57 : f32 to vector<2x32xf32>
      %116 = arith.maximumf %114, %115 : vector<2x32xf32>
      %117 = arith.truncf %116 : vector<2x32xf32> to vector<2x32xbf16>
      %c0_58 = arith.constant 0 : index
      %c0_59 = arith.constant 0 : index
      %118 = vector.load %arg23[%c0_58, %c0_59] : memref<32x16xbf16, #tpu.memory_space<vmem>>, vector<32x16xbf16>
      %cst_60 = arith.constant dense<0.000000e+00> : vector<2x16xf32>
      %119 = tpu.matmul %117, %118, %cst_60 {dimension_numbers = #tpu.dot_dimension_numbers<[1], [0], [0], [1], [0, 0, 1, 1], [], []>} : vector<2x32xbf16>, vector<32x16xbf16>, vector<2x16xf32> -> vector<2x16xf32>
      %cst_61 = arith.constant dense<0.000000e+00> : vector<16xf32>
      %120 = vector.multi_reduction <add>, %119, %cst_61 [0] : vector<2x16xf32> to vector<16xf32>
      %121 = vector.shape_cast %120 : vector<16xf32> to vector<1x16xf32>
      %cst_62 = arith.constant 2.000000e+00 : f32
      %122 = vector.broadcast %cst_62 : f32 to vector<1x16xf32>
      %123 = arith.divf %121, %122 : vector<1x16xf32>
      %124 = vector.broadcast %123 : vector<1x16xf32> to vector<2x16xf32>
      %125 = arith.subf %119, %124 : vector<2x16xf32>
      %126 = arith.mulf %125, %125 : vector<2x16xf32>
      %cst_63 = arith.constant dense<0.000000e+00> : vector<16xf32>
      %127 = vector.multi_reduction <add>, %126, %cst_63 [0] : vector<2x16xf32> to vector<16xf32>
      %128 = vector.shape_cast %127 : vector<16xf32> to vector<1x16xf32>
      %cst_64 = arith.constant 2.000000e+00 : f32
      %129 = vector.broadcast %cst_64 : f32 to vector<1x16xf32>
      %130 = arith.divf %128, %129 : vector<1x16xf32>
      %131 = vector.broadcast %123 : vector<1x16xf32> to vector<2x16xf32>
      %132 = arith.subf %119, %131 : vector<2x16xf32>
      %cst_65 = arith.constant 9.99999974E-6 : f32
      %133 = vector.broadcast %cst_65 : f32 to vector<1x16xf32>
      %134 = arith.addf %130, %133 : vector<1x16xf32>
      %135 = math.rsqrt %134 : vector<1x16xf32>
      %136 = vector.broadcast %135 : vector<1x16xf32> to vector<2x16xf32>
      %137 = arith.mulf %132, %136 : vector<2x16xf32>
      %c0_66 = arith.constant 0 : index
      %c0_67 = arith.constant 0 : index
      %138 = vector.load %arg8[%c0_66, %c0_67] : memref<1x16xf32, #tpu.memory_space<vmem>>, vector<1x16xf32>
      %139 = vector.broadcast %138 : vector<1x16xf32> to vector<2x16xf32>
      %140 = arith.mulf %137, %139 : vector<2x16xf32>
      %c0_68 = arith.constant 0 : index
      %c0_69 = arith.constant 0 : index
      %141 = vector.load %arg9[%c0_68, %c0_69] : memref<1x16xf32, #tpu.memory_space<vmem>>, vector<1x16xf32>
      %142 = vector.broadcast %141 : vector<1x16xf32> to vector<2x16xf32>
      %143 = arith.addf %140, %142 : vector<2x16xf32>
      %144 = arith.truncf %143 : vector<2x16xf32> to vector<2x16xbf16>
      %c0_70 = arith.constant 0 : index
      %c0_71 = arith.constant 0 : index
      %145 = vector.load %arg24[%c0_70, %c0_71] : memref<16x32xbf16, #tpu.memory_space<vmem>>, vector<16x32xbf16>
      %cst_72 = arith.constant dense<0.000000e+00> : vector<2x32xf32>
      %146 = tpu.matmul %144, %145, %cst_72 {dimension_numbers = #tpu.dot_dimension_numbers<[1], [0], [0], [1], [0, 0, 1, 1], [], []>} : vector<2x16xbf16>, vector<16x32xbf16>, vector<2x32xf32> -> vector<2x32xf32>
      %cst_73 = arith.constant dense<0.000000e+00> : vector<32xf32>
      %147 = vector.multi_reduction <add>, %146, %cst_73 [0] : vector<2x32xf32> to vector<32xf32>
      %148 = vector.shape_cast %147 : vector<32xf32> to vector<1x32xf32>
      %cst_74 = arith.constant 2.000000e+00 : f32
      %149 = vector.broadcast %cst_74 : f32 to vector<1x32xf32>
      %150 = arith.divf %148, %149 : vector<1x32xf32>
      %151 = vector.broadcast %150 : vector<1x32xf32> to vector<2x32xf32>
      %152 = arith.subf %146, %151 : vector<2x32xf32>
      %153 = arith.mulf %152, %152 : vector<2x32xf32>
      %cst_75 = arith.constant dense<0.000000e+00> : vector<32xf32>
      %154 = vector.multi_reduction <add>, %153, %cst_75 [0] : vector<2x32xf32> to vector<32xf32>
      %155 = vector.shape_cast %154 : vector<32xf32> to vector<1x32xf32>
      %cst_76 = arith.constant 2.000000e+00 : f32
      %156 = vector.broadcast %cst_76 : f32 to vector<1x32xf32>
      %157 = arith.divf %155, %156 : vector<1x32xf32>
      %158 = vector.broadcast %150 : vector<1x32xf32> to vector<2x32xf32>
      %159 = arith.subf %146, %158 : vector<2x32xf32>
      %cst_77 = arith.constant 9.99999974E-6 : f32
      %160 = vector.broadcast %cst_77 : f32 to vector<1x32xf32>
      %161 = arith.addf %157, %160 : vector<1x32xf32>
      %162 = math.rsqrt %161 : vector<1x32xf32>
      %163 = vector.broadcast %162 : vector<1x32xf32> to vector<2x32xf32>
      %164 = arith.mulf %159, %163 : vector<2x32xf32>
      %c0_78 = arith.constant 0 : index
      %c0_79 = arith.constant 0 : index
      %165 = vector.load %arg10[%c0_78, %c0_79] : memref<1x32xf32, #tpu.memory_space<vmem>>, vector<1x32xf32>
      %166 = vector.broadcast %165 : vector<1x32xf32> to vector<2x32xf32>
      %167 = arith.mulf %164, %166 : vector<2x32xf32>
      %c0_80 = arith.constant 0 : index
      %c0_81 = arith.constant 0 : index
      %168 = vector.load %arg11[%c0_80, %c0_81] : memref<1x32xf32, #tpu.memory_space<vmem>>, vector<1x32xf32>
      %169 = vector.broadcast %168 : vector<1x32xf32> to vector<2x32xf32>
      %170 = arith.addf %167, %169 : vector<2x32xf32>
      %cst_82 = arith.constant 0.000000e+00 : f32
      %171 = vector.broadcast %cst_82 : f32 to vector<2x32xf32>
      %172 = arith.maximumf %170, %171 : vector<2x32xf32>
      %173 = arith.truncf %172 : vector<2x32xf32> to vector<2x32xbf16>
      %c0_83 = arith.constant 0 : index
      %c0_84 = arith.constant 0 : index
      %174 = vector.load %arg25[%c0_83, %c0_84] : memref<32x16xbf16, #tpu.memory_space<vmem>>, vector<32x16xbf16>
      %cst_85 = arith.constant dense<0.000000e+00> : vector<2x16xf32>
      %175 = tpu.matmul %173, %174, %cst_85 {dimension_numbers = #tpu.dot_dimension_numbers<[1], [0], [0], [1], [0, 0, 1, 1], [], []>} : vector<2x32xbf16>, vector<32x16xbf16>, vector<2x16xf32> -> vector<2x16xf32>
      %c0_86 = arith.constant 0 : index
      %c0_87 = arith.constant 0 : index
      %176 = vector.load %arg12[%c0_86, %c0_87] : memref<1x16xf32, #tpu.memory_space<vmem>>, vector<1x16xf32>
      %177 = vector.broadcast %176 : vector<1x16xf32> to vector<2x16xf32>
      %178 = arith.addf %175, %177 : vector<2x16xf32>
      %cst_88 = arith.constant 0.000000e+00 : f32
      %179 = vector.broadcast %cst_88 : f32 to vector<2x112xf32>
      %180 = tpu.concatenate %143, %179 in 1 : vector<2x16xf32>, vector<2x112xf32> -> vector<2x128xf32>
      %181 = tpu.concatenate %178, %179 in 1 : vector<2x16xf32>, vector<2x112xf32> -> vector<2x128xf32>
      %c0_89 = arith.constant 0 : index
      %c0_90 = arith.constant 0 : index
      %182 = vector.load %arg18[%c0_89, %c0_90] : memref<2x128xf32, #tpu.memory_space<vmem>>, vector<2x128xf32>
      tpu.vector_store %arg18[%c0_89, %c0_90], %180 {strides = array<i32>} : memref<2x128xf32, #tpu.memory_space<vmem>>, vector<2x128xf32>,
      %c0_91 = arith.constant 0 : index
      %c0_92 = arith.constant 0 : index
      %183 = vector.load %arg19[%c0_91, %c0_92] : memref<2x128xf32, #tpu.memory_space<vmem>>, vector<2x128xf32>
      tpu.vector_store %arg19[%c0_91, %c0_92], %181 {strides = array<i32>} : memref<2x128xf32, #tpu.memory_space<vmem>>, vector<2x128xf32>,
    } else {
    }
    return
  }
  func.func @transform_0(%arg0: i32) -> (i32, i32, i32) {
    %c0_i32 = arith.constant 0 : i32
    %c0_i32_0 = arith.constant 0 : i32
    %c0_i32_1 = arith.constant 0 : i32
    return %c0_i32, %c0_i32_0, %arg0 : i32, i32, i32
  }
  func.func @transform_1(%arg0: i32) -> (i32, i32) {
    %c0_i32 = arith.constant 0 : i32
    %c0_i32_0 = arith.constant 0 : i32
    %c0_i32_1 = arith.constant 0 : i32
    return %c0_i32, %c0_i32_0 : i32, i32
  }
  func.func @transform_2(%arg0: i32) -> (i32, i32) {
    %c0_i32 = arith.constant 0 : i32
    %c0_i32_0 = arith.constant 0 : i32
    %c0_i32_1 = arith.constant 0 : i32
    return %c0_i32, %c0_i32_0 : i32, i32
  }
  func.func @transform_3(%arg0: i32) -> (i32, i32) {
    %c0_i32 = arith.constant 0 : i32
    %c0_i32_0 = arith.constant 0 : i32
    %c0_i32_1 = arith.constant 0 : i32
    return %c0_i32, %c0_i32_0 : i32, i32
  }
  func.func @transform_4(%arg0: i32) -> (i32, i32) {
    %c0_i32 = arith.constant 0 : i32
    %c0_i32_0 = arith.constant 0 : i32
    %c0_i32_1 = arith.constant 0 : i32
    return %c0_i32, %c0_i32_0 : i32, i32
  }
  func.func @transform_5(%arg0: i32) -> (i32, i32) {
    %c0_i32 = arith.constant 0 : i32
    %c0_i32_0 = arith.constant 0 : i32
    %c0_i32_1 = arith.constant 0 : i32
    return %c0_i32, %c0_i32_0 : i32, i32
  }
  func.func @transform_6(%arg0: i32) -> (i32, i32) {
    %c0_i32 = arith.constant 0 : i32
    %c0_i32_0 = arith.constant 0 : i32
    %c0_i32_1 = arith.constant 0 : i32
    return %c0_i32, %c0_i32_0 : i32, i32
  }
  func.func @transform_7(%arg0: i32) -> (i32, i32) {
    %c0_i32 = arith.constant 0 : i32
    %c0_i32_0 = arith.constant 0 : i32
    %c0_i32_1 = arith.constant 0 : i32
    return %c0_i32, %c0_i32_0 : i32, i32
  }
  func.func @transform_8(%arg0: i32) -> (i32, i32) {
    %c0_i32 = arith.constant 0 : i32
    %c0_i32_0 = arith.constant 0 : i32
    %c0_i32_1 = arith.constant 0 : i32
    return %c0_i32, %c0_i32_0 : i32, i32
  }
  func.func @transform_9(%arg0: i32) -> (i32, i32) {
    %c0_i32 = arith.constant 0 : i32
    %c0_i32_0 = arith.constant 0 : i32
    %c0_i32_1 = arith.constant 0 : i32
    return %c0_i32, %c0_i32_0 : i32, i32
  }
  func.func @transform_10(%arg0: i32) -> (i32, i32) {
    %c0_i32 = arith.constant 0 : i32
    %c0_i32_0 = arith.constant 0 : i32
    %c0_i32_1 = arith.constant 0 : i32
    return %c0_i32, %c0_i32_0 : i32, i32
  }
  func.func @transform_11(%arg0: i32) -> (i32, i32) {
    %c0_i32 = arith.constant 0 : i32
    %c0_i32_0 = arith.constant 0 : i32
    %c0_i32_1 = arith.constant 0 : i32
    return %c0_i32, %c0_i32_0 : i32, i32
  }
  func.func @transform_17(%arg0: i32) -> (i32, i32) {
    %c0_i32 = arith.constant 0 : i32
    %c0_i32_0 = arith.constant 0 : i32
    %c0_i32_1 = arith.constant 0 : i32
    return %c0_i32, %c0_i32_0 : i32, i32
  }
  func.func @transform_18(%arg0: i32) -> (i32, i32) {
    %c0_i32 = arith.constant 0 : i32
    %c0_i32_0 = arith.constant 0 : i32
    %c0_i32_1 = arith.constant 0 : i32
    return %c0_i32, %c0_i32_0 : i32, i32
  }
}

</mosaic_0001>

<bundles_post_ra>
// kernel: tpu_custom_call.1
= control target key start
LH: loop header
LB: loop body
LE: loop exit
PB: predicated region body
PF: predicated region fallthrough
CT: control target
= control target key end

     0   :  { %s1789_s0 = inlined_call_operand.vmem [shape: f32[2,4,256], index: 0, kind: input, shape index: {}]   ;;  %s1790_s1 = inlined_call_operand.vmem [shape: f32[32,4], index: 1, kind: input, shape index: {}]   ;;  %s1791_s2 = inlined_call_operand.vmem [shape: f32[32,1], index: 2, kind: input, shape index: {}]   ;;  %s1792_s3 = inlined_call_operand.vmem [shape: f32[1,32], index: 3, kind: input, shape index: {}]   ;;  %s1793_s4 = inlined_call_operand.vmem [shape: f32[1,32], index: 4, kind: input, shape index: {}]   ;;  %s1794_s5 = inlined_call_operand.vmem [shape: f32[1,32], index: 5, kind: input, shape index: {}]   ;;  %s1795_s6 = inlined_call_operand.vmem [shape: f32[1,32], index: 6, kind: input, shape index: {}]   ;;  %s1796_s7 = inlined_call_operand.vmem [shape: f32[1,16], index: 7, kind: input, shape index: {}]   ;;  %s1797_s8 = inlined_call_operand.vmem [shape: f32[1,16], index: 8, kind: input, shape index: {}]   ;;  %s1798_s9 = inlined_call_operand.vmem [shape: f32[1,32], index: 9, kind: input, shape index: {}]   ;;  %s1799_s10 = inlined_call_operand.vmem [shape: f32[1,32], index: 10, kind: input, shape index: {}]   ;;  %s1800_s11 = inlined_call_operand.vmem [shape: f32[1,16], index: 11, kind: input, shape index: {}]   ;;  %s1801_s12 = inlined_call_operand.vmem [shape: bf16[32,32], index: 12, kind: input, shape index: {}]   ;;  %s1802_s13 = inlined_call_operand.vmem [shape: bf16[32,32], index: 13, kind: input, shape index: {}]   ;;  %s1803_s14 = inlined_call_operand.vmem [shape: bf16[32,16], index: 14, kind: input, shape index: {}]   ;;  %s1804_s15 = inlined_call_operand.vmem [shape: bf16[16,32], index: 15, kind: input, shape index: {}]   ;;  %s1805_s16 = inlined_call_operand.vmem [shape: bf16[32,16], index: 16, kind: input, shape index: {}]   ;;  %s1806_s17 = inlined_call_operand.hbm [shape: f32[2,128], index: 17, kind: output, shape index: {0}]   ;;  %s1807_s18 = inlined_call_operand.hbm [shape: f32[2,128], index: 18, kind: output, shape index: {1}]  }
   0x1   :  { %1816 = sst [smem:[#allocation36_spill]] %s1789_s0 }
   0x2   :  { %1817 = sst [smem:[#allocation37_spill]] %s1790_s1 }
   0x3   :  { %1818 = sst [smem:[#allocation38_spill]] %s1791_s2 }
   0x4   :  { %24 = vsyncpa [#allocation10], 0 }
   0x5   :  { %25 = vsyncpa [#allocation12], 0  ;;  %vm55_vm0 = vcmask 254976   ;;  %v1492_v0 = vld [vmem:[%s1801_s12] sm:$0xff]  ;;  %v1497_v1 = vld [vmem:[%s1801_s12 + $0x8] sm:$0xff]  ;;  %v1811_v2 = vmov 0.0  }
   0x6   :  { %1819 = vst [vmem:[#allocation25_spill] sm:$0xff] %v1492_v0  ;;  %1820 = vst [vmem:[#allocation26_spill] sm:$0xff] %v1497_v1 }
   0x7   :  { %56 = vst.msk [vmem:[#allocation2] sm:$0x3] %vm55_vm0, %v1811_v2 }
   0x8   :  { %100 = vsyncadd [#allocation8], 256  ;;  %v1504_v3 = vld [vmem:[%s1802_s13] sm:$0xff]  ;;  %v1509_v4 = vld [vmem:[%s1802_s13 + $0x8] sm:$0xff] }
   0x9   :  { %1821 = vst [vmem:[#allocation27_spill] sm:$0xff] %v1504_v3  ;;  %1822 = vst [vmem:[#allocation28_spill] sm:$0xff] %v1509_v4 }
   0xa   :  { %145 = vsyncadd [#allocation8 + $0x1], 256  ;;  %v1514_v5 = vld [vmem:[%s1803_s14] sm:$0xff]  ;;  %v1519_v6 = vld [vmem:[%s1803_s14 + $0x8] sm:$0xff] }
   0xb   :  { %1823 = vst [vmem:[#allocation29_spill] sm:$0xff] %v1514_v5  ;;  %1824 = vst [vmem:[#allocation30_spill] sm:$0xff] %v1519_v6 }
   0xc   :  { %190 = vsyncadd [#allocation8 + $0x2], 256  ;;  %v1524_v7 = vld [vmem:[%s1804_s15] sm:$0xff] }
   0xd   :  { %1825 = vst [vmem:[#allocation31_spill] sm:$0xff] %v1524_v7 }
   0xe   :  { %233 = vsyncadd [#allocation8 + $0x3], 128  ;;  %v1529_v8 = vld [vmem:[%s1805_s16] sm:$0xff]  ;;  %v1534_v9 = vld [vmem:[%s1805_s16 + $0x8] sm:$0xff]  ;;  %s1828_s29 = sld [smem:[#allocation37_spill]]  ;;  %v1387_v11 = vmov 2  }
   0xf   :  { %1826 = vst [vmem:[#allocation32_spill] sm:$0xff] %v1529_v8  ;;  %1827 = vst [vmem:[#allocation33_spill] sm:$0xff] %v1534_v9  ;;  %1314 = vset.pattern.permute.xlu0 %v1387_v11  ;;  %v1388_v12 = vmov 1  }
  0x10   :  { %1313 = vset.pattern.permute.xlu1 %v1388_v12 }
  0x14   :  { %v282_v10 = vld [vmem:[%s1828_s29] sm:$0xff]  ;;  %v285_v13 = vld [vmem:[%s1828_s29 + $0x18] sm:$0xff]  ;;  %v283_v14 = vld [vmem:[%s1828_s29 + $0x8] sm:$0xff] }
  0x15   :  { %445 = vperm.xlu0 %1314, %v282_v10   ;;  %371 = vperm.xlu1 %1313, %v282_v10  }
  0x16   :  { %278 = vsyncadd [#allocation8 + $0x4], 256  ;;  %v284_v15 = vld [vmem:[%s1828_s29 + $0x10] sm:$0xff]  ;;  %v1389_v16 = vmov 3   ;;  %v1390_v17 = vmov 0   ;;  %s1829_s22 = sld [smem:[#allocation38_spill]]  ;;  %v1813_v22 = vlaneseq }
  0x17   :  { %s1831_s28 = sld [smem:[#allocation36_spill]]  ;;  %vm666_vm1 = vcmask 130112   ;;  %vm673_vm2 = vcmask 195712   ;;  %vm680_vm3 = vcmask 261312   ;;  %vm701_vm4 = vcmask 1041409  }
  0x18   :  { %v1561_v23 = vshrl.u32 %v1813_v22, 7 }
  0x19   :  { %457 = vperm.xlu0 %1314, %v285_v13   ;;  %375 = vperm.xlu1 %1313, %v283_v14  }
  0x1a   :  { %1830 = vst [vmem:[#allocation34_spill] sm:$0xff] %v1561_v23  ;;  %v290_v26 = vsub.s32 0, %v1561_v23  ;;  %v294_v27 = vsub.s32 1, %v1561_v23 }
  0x1c   :  { %v566_v18 = vld [vmem:[%s1829_s22] sm:$0xff]  ;;  %v569_v19 = vld [vmem:[%s1829_s22 + $0x18] sm:$0xff]  ;;  %v567_v20 = vld [vmem:[%s1829_s22 + $0x8] sm:$0xff] }
  0x1d   :  { %1317 = vset.pattern.permute.xlu0 %v1389_v16  ;;  %379 = vperm.xlu1 %1313, %v284_v15   ;;  %v568_v21 = vld [vmem:[%s1829_s22 + $0x10] sm:$0xff]  ;;  %v1228_v28 = vld [vmem:[%s1831_s28 + $0x1] ss:$4 sm:$0x3] }
  0x1e   :  { %523 = vperm.xlu0 %1317, %v283_v14   ;;  %v1229_v29 = vld [vmem:[%s1831_s28 + $0x9] ss:$4 sm:$0x3]  ;;  %v1230_v32 = vld [vmem:[%s1831_s28 + $0x2] ss:$4 sm:$0x3]  ;;  %v353_v36 = vrot.slane %v1228_v28, %v290_v26  ;;  %v357_v37 = vrot.slane %v1228_v28, %v294_v27 }
  0x1f   :  { %v1231_v33 = vld [vmem:[%s1831_s28 + $0xa] ss:$4 sm:$0x3]  ;;  %v1232_v34 = vld [vmem:[%s1831_s28 + $0x3] ss:$4 sm:$0x3]  ;;  %v361_v38 = vrot.slane %v1229_v29, %v290_v26  ;;  %v365_v41 = vrot.slane %v1229_v29, %v294_v27  ;;  %v1589_v42 = vrot.slane %v1230_v32, %v290_v26  ;;  %v1591_v43 = vrot.slane %v1230_v32, %v294_v27 }
  0x20   :  { %v1233_v35 = vld [vmem:[%s1831_s28 + $0xb] ss:$4 sm:$0x3]  ;;  %v279_v39 = vld [vmem:[%s1831_s28] ss:$4 sm:$0x3]  ;;  %v1593_v44 = vrot.slane %v1231_v33, %v290_v26  ;;  %v1595_v46 = vrot.slane %v1231_v33, %v294_v27  ;;  %v1597_v47 = vrot.slane %v1232_v34, %v290_v26  ;;  %v1599_v48 = vrot.slane %v1232_v34, %v294_v27 }
  0x21   :  { %383 = vperm.xlu1 %1313, %v285_v13   ;;  %v1227_v40 = vld [vmem:[%s1831_s28 + $0x8] ss:$4 sm:$0x3]  ;;  %v1601_v49 = vrot.slane %v1233_v35, %v290_v26  ;;  %v1603_v51 = vrot.slane %v1233_v35, %v294_v27  ;;  %v1605_v52 = vrot.slane %v279_v39, %v290_v26  ;;  %v1607_v53 = vrot.slane %v279_v39, %v294_v27 }
  0x22   :  { %1318 = vset.pattern.permute.xlu0 %v1390_v17  ;;  %v1609_v54 = vrot.slane %v1227_v40, %v290_v26  ;;  %v1611_v58 = vrot.slane %v1227_v40, %v294_v27 }
  0x23   :  { %310 = vperm.xlu0 %1318, %v282_v10  }
  0x25   :  { %1315 = vset.pattern.permute.xlu1 %v1387_v11 }
  0x26   :  { %449 = vperm.xlu1 %1315, %v283_v14  }
  0x27   :  { %315 = vperm.xlu0 %1318, %v283_v14  }
  0x2a   :  { %453 = vperm.xlu1 %1315, %v284_v15  }
  0x2b   :  { %320 = vperm.xlu0 %1318, %v284_v15  }
  0x2e   :  { %1316 = vset.pattern.permute.xlu1 %v1389_v16 }
  0x2f   :  { %325 = vperm.xlu0 %1318, %v285_v13   ;;  %519 = vperm.xlu1 %1316, %v282_v10  }
  0x33   :  { %572 = vperm.xlu0 %1318, %v566_v18   ;;  %527 = vperm.xlu1 %1316, %v284_v15  }
  0x37   :  { %587 = vperm.xlu0 %1318, %v569_v19   ;;  %531 = vperm.xlu1 %1316, %v285_v13  }
  0x3b   :  { %1319 = vset.pattern.permute.xlu1 %v1390_v17 }
  0x3c   :  { %577 = vperm.xlu1 %1319, %v567_v20  }
  0x40   :  { %582 = vperm.xlu1 %1319, %v568_v21  }
  0x94   :  { %v372_v24 = vpop.permute.xlu1 %371  ;;  %v446_v25 = vpop.permute.xlu0 %445 }
  0x95   :  { %v386_v55 = vmul.f32 %v372_v24, %v353_v36  ;;  %v387_v56 = vmul.f32 %v372_v24, %v357_v37  ;;  %v394_v57 = vmul.f32 %v372_v24, %v361_v38  ;;  %v395_v59 = vmul.f32 %v372_v24, %v365_v41 }
  0x96   :  { %v460_v60 = vmul.f32 %v446_v25, %v1589_v42  ;;  %v461_v61 = vmul.f32 %v446_v25, %v1591_v43  ;;  %v468_v62 = vmul.f32 %v446_v25, %v1593_v44  ;;  %v469_v10 = vmul.f32 %v446_v25, %v1595_v46 }
  0x98   :  { %v376_v30 = vpop.permute.xlu1 %375  ;;  %v458_v31 = vpop.permute.xlu0 %457 }
  0x99   :  { %v388_v11 = vmul.f32 %v376_v30, %v353_v36  ;;  %v389_v12 = vmul.f32 %v376_v30, %v357_v37  ;;  %v396_v13 = vmul.f32 %v376_v30, %v361_v38  ;;  %v397_v14 = vmul.f32 %v376_v30, %v365_v41 }
  0x9a   :  { %v1618_v15 = vmul.f32 %v458_v31, %v1589_v42  ;;  %v1621_v16 = vmul.f32 %v458_v31, %v1591_v43  ;;  %v1624_v17 = vmul.f32 %v458_v31, %v1593_v44  ;;  %v1627_v19 = vmul.f32 %v458_v31, %v1595_v46 }
  0x9c   :  { %v380_v45 = vpop.permute.xlu1 %379  ;;  %1832 = vst [vmem:[#allocation35_spill] sm:$0xff] %v1621_v16 }
  0x9d   :  { %v524_v50 = vpop.permute.xlu0 %523  ;;  %v390_v20 = vmul.f32 %v380_v45, %v353_v36  ;;  %v391_v21 = vmul.f32 %v380_v45, %v357_v37  ;;  %v398_v25 = vmul.f32 %v380_v45, %v361_v38  ;;  %v1633_v29 = vmul.f32 %v380_v45, %v365_v41 }
  0x9e   :  { %v1636_v30 = vmul.f32 %v524_v50, %v1597_v47  ;;  %v1639_v32 = vmul.f32 %v524_v50, %v1599_v48  ;;  %v1642_v31 = vmul.f32 %v524_v50, %v1601_v49  ;;  %v1645_v34 = vmul.f32 %v524_v50, %v1603_v51 }
  0xa0   :  { %v384_v63 = vpop.permute.xlu1 %383 }
  0xa1   :  { %v392_v35 = vmul.f32 %v384_v63, %v353_v36  ;;  %v1647_v39 = vmul.f32 %v384_v63, %v357_v37  ;;  %v400_v8 = vmul.f32 %v384_v63, %v361_v38  ;;  %v401_v4 = vmul.f32 %v384_v63, %v365_v41 }
  0xa2   :  { %v311_v18 = vpop.permute.xlu0 %310 }
  0xa3   :  { %v328_v24 = vmul.f32 %v311_v18, %v1605_v52  ;;  %v329_v26 = vmul.f32 %v311_v18, %v1607_v53  ;;  %v336_v27 = vmul.f32 %v311_v18, %v1609_v54  ;;  %v337_v28 = vmul.f32 %v311_v18, %v1611_v58 }
  0xa5   :  { %v450_v33 = vpop.permute.xlu1 %449  ;;  %v402_v40 = vadd.f32 %v386_v55, %v328_v24  ;;  %v403_v7 = vadd.f32 %v387_v56, %v329_v26  ;;  %v410_v6 = vadd.f32 %v394_v57, %v336_v27  ;;  %v411_v5 = vadd.f32 %v395_v59, %v337_v28 }
  0xa6   :  { %v316_v18 = vpop.permute.xlu0 %315  ;;  %v462_v50 = vmul.f32 %v450_v33, %v1589_v42  ;;  %v463_v36 = vmul.f32 %v450_v33, %v1591_v43  ;;  %v470_v37 = vmul.f32 %v450_v33, %v1593_v44  ;;  %v471_v24 = vmul.f32 %v450_v33, %v1595_v46 }
  0xa7   :  { %v330_v45 = vmul.f32 %v316_v18, %v1605_v52  ;;  %v331_v2 = vmul.f32 %v316_v18, %v1607_v53  ;;  %v338_v22 = vmul.f32 %v316_v18, %v1609_v54  ;;  %v339_v9 = vmul.f32 %v316_v18, %v1611_v58 }
  0xa8   :  { %v476_v57 = vadd.f32 %v460_v60, %v402_v40  ;;  %v477_v59 = vadd.f32 %v461_v61, %v403_v7  ;;  %v484_v63 = vadd.f32 %v468_v62, %v410_v6  ;;  %v485_v26 = vadd.f32 %v469_v10, %v411_v5 }
  0xa9   :  { %v454_v55 = vpop.permute.xlu1 %453  ;;  %v404_v1 = vadd.f32 %v388_v11, %v330_v45  ;;  %v405_v3 = vadd.f32 %v389_v12, %v331_v2  ;;  %v412_v0 = vadd.f32 %v396_v13, %v338_v22  ;;  %v413_v16 = vadd.f32 %v397_v14, %v339_v9 }
  0xaa   :  { %v321_v23 = vpop.permute.xlu0 %320  ;;  %v464_v41 = vmul.f32 %v454_v55, %v1589_v42  ;;  %v465_v27 = vmul.f32 %v454_v55, %v1591_v43  ;;  %v472_v28 = vmul.f32 %v454_v55, %v1593_v44  ;;  %v473_v11 = vmul.f32 %v454_v55, %v1595_v46 }
  0xab   :  { %v332_v38 = vmul.f32 %v321_v23, %v1605_v52  ;;  %v333_v56 = vmul.f32 %v321_v23, %v1607_v53  ;;  %v340_v2 = vmul.f32 %v321_v23, %v1609_v54  ;;  %v341_v9 = vmul.f32 %v321_v23, %v1611_v58 }
  0xac   :  { %v478_v13 = vadd.f32 %v462_v50, %v404_v1  ;;  %v479_v14 = vadd.f32 %v463_v36, %v405_v3  ;;  %v486_v60 = vadd.f32 %v470_v37, %v412_v0  ;;  %v487_v5 = vadd.f32 %v471_v24, %v413_v16 }
  0xad   :  { %v406_v33 = vadd.f32 %v390_v20, %v332_v38  ;;  %v407_v42 = vadd.f32 %v391_v21, %v333_v56  ;;  %v414_v61 = vadd.f32 %v398_v25, %v340_v2  ;;  %v415_v21 = vadd.f32 %v1633_v29, %v341_v9 }
  0xae   :  { %v326_v22 = vpop.permute.xlu0 %325  ;;  %v520_v12 = vpop.permute.xlu1 %519  ;;  %v552_v40 = vadd.f32 %v1636_v30, %v478_v13  ;;  %v553_v18 = vadd.f32 %v1639_v32, %v479_v14  ;;  %v560_v25 = vadd.f32 %v1642_v31, %v486_v60 }
  0xaf   :  { %v334_v6 = vmul.f32 %v326_v22, %v1605_v52  ;;  %v534_v7 = vmul.f32 %v520_v12, %v1597_v47  ;;  %v535_v43 = vmul.f32 %v520_v12, %v1599_v48  ;;  %v542_v44 = vmul.f32 %v520_v12, %v1601_v49 }
  0xb0   :  { %v543_v46 = vmul.f32 %v520_v12, %v1603_v51  ;;  %v335_v23 = vmul.f32 %v326_v22, %v1607_v53  ;;  %v342_v1 = vmul.f32 %v326_v22, %v1609_v54  ;;  %v343_v0 = vmul.f32 %v326_v22, %v1611_v58 }
  0xb1   :  { %v550_v10 = vadd.f32 %v534_v7, %v476_v57  ;;  %v551_v52 = vadd.f32 %v535_v43, %v477_v59  ;;  %v558_v16 = vadd.f32 %v542_v44, %v484_v63  ;;  %v408_v45 = vadd.f32 %v392_v35, %v334_v6 }
  0xb2   :  { %v573_v3 = vpop.permute.xlu0 %572  ;;  %v528_v62 = vpop.permute.xlu1 %527  ;;  %v559_v20 = vadd.f32 %v543_v46, %v485_v26  ;;  %v561_v54 = vadd.f32 %v1645_v34, %v487_v5  ;;  %v409_v58 = vadd.f32 %v1647_v39, %v335_v23  ;;  %v416_v36 = vadd.f32 %v400_v8, %v342_v1 }
  0xb3   :  { %v590_v53 = vadd.f32 %v573_v3, %v550_v10  ;;  %v591_v50 = vadd.f32 %v573_v3, %v551_v52  ;;  %v417_v37 = vadd.f32 %v401_v4, %v343_v0  ;;  %v538_v55 = vmul.f32 %v528_v62, %v1597_v47 }
  0xb4   :  { %v598_v56 = vadd.f32 %v573_v3, %v558_v16  ;;  %v599_v30 = vadd.f32 %v573_v3, %v559_v20  ;;  %v546_v32 = vmul.f32 %v528_v62, %v1601_v49  ;;  %v547_v31 = vmul.f32 %v528_v62, %v1603_v51 }
  0xb5   :  { %v606_v38 = vmax.f32 %v590_v53, 0.0  ;;  %v607_v29 = vmax.f32 %v591_v50, 0.0  ;;  %v539_v34 = vmul.f32 %v528_v62, %v1599_v48  ;;  %v488_v8 = vadd.f32 %v472_v28, %v414_v61 }
  0xb6   :  { %v532_v24 = vpop.permute.xlu1 %531  ;;  %v489_v4 = vadd.f32 %v473_v11, %v415_v21  ;;  %v480_v59 = vadd.f32 %v464_v41, %v406_v33  ;;  %v481_v63 = vadd.f32 %v465_v27, %v407_v42  ;;  %v490_v26 = vadd.f32 %v1624_v17, %v416_v36  ;;  %v1833_v42 = vld [vmem:[#allocation35_spill] sm:$0xff]  ;;  %v588_v5 = vpop.permute.xlu0 %587 }
  0xb7   :  { %v548_v35 = vmul.f32 %v532_v24, %v1601_v49  ;;  %v549_v57 = vmul.f32 %v532_v24, %v1603_v51  ;;  %v623_v39 = vadd.f32 %v607_v29, %v606_v38  ;;  %v491_v2 = vadd.f32 %v1627_v19, %v417_v37 }
  0xb8   :  { %v540_v9 = vmul.f32 %v532_v24, %v1597_v47  ;;  %v541_v22 = vmul.f32 %v532_v24, %v1599_v48  ;;  %v614_v12 = vmax.f32 %v598_v56, 0.0  ;;  %v615_v49 = vmax.f32 %v599_v30, 0.0 }
  0xb9   :  { %624 = vadd.xlane.f32.xlu1 %v623_v39  ;;  %v562_v51 = vadd.f32 %v546_v32, %v488_v8  ;;  %v563_v14 = vadd.f32 %v547_v31, %v489_v4  ;;  %v564_v60 = vadd.f32 %v548_v35, %v490_v26  ;;  %v565_v6 = vadd.f32 %v549_v57, %v491_v2  ;;  %v1835_v4 = vld [vmem:[#allocation34_spill] sm:$0xff] }
  0xba   :  { %v554_v33 = vadd.f32 %v538_v55, %v480_v59  ;;  %v555_v17 = vadd.f32 %v539_v34, %v481_v63  ;;  %v482_v19 = vadd.f32 %v1618_v15, %v408_v45  ;;  %v483_v47 = vadd.f32 %v1833_v42, %v409_v58 }
  0xbb   :  { %v578_v13 = vpop.permute.xlu1 %577  ;;  %v604_v61 = vadd.f32 %v588_v5, %v564_v60  ;;  %v605_v23 = vadd.f32 %v588_v5, %v565_v6  ;;  %v1834_v56 = vlaneseq }
  0xbc   :  { %v592_v28 = vadd.f32 %v578_v13, %v552_v40  ;;  %v593_v11 = vadd.f32 %v578_v13, %v553_v18  ;;  %v600_v41 = vadd.f32 %v578_v13, %v560_v25  ;;  %v601_v27 = vadd.f32 %v578_v13, %v561_v54 }
  0xbd   :  { %v556_v1 = vadd.f32 %v540_v9, %v482_v19  ;;  %v557_v0 = vadd.f32 %v541_v22, %v483_v47  ;;  %v635_v40 = vadd.f32 %v615_v49, %v614_v12  ;;  %v620_v18 = vmax.f32 %v604_v61, 0.0  ;;  %v622_v19 = vld [vmem:[#allocation2] sm:$0x3] }
  0xbe   :  { %v608_v48 = vmax.f32 %v592_v28, 0.0  ;;  %v609_v7 = vmax.f32 %v593_v11, 0.0  ;;  %v616_v43 = vmax.f32 %v600_v41, 0.0  ;;  %v617_v44 = vmax.f32 %v601_v27, 0.0 }
  0xbf   :  { %v583_v46 = vpop.permute.xlu1 %582  ;;  %v621_v25 = vmax.f32 %v605_v23, 0.0  ;;  %v596_v45 = vadd.f32 %v588_v5, %v556_v1  ;;  %v597_v58 = vadd.f32 %v588_v5, %v557_v0  ;;  %v656_v30 = vand.u32 127, %v1834_v56 }
  0xc0   :  { %v626_v3 = vadd.f32 %v609_v7, %v608_v48  ;;  %v638_v62 = vadd.f32 %v617_v44, %v616_v43  ;;  %v602_v10 = vadd.f32 %v583_v46, %v562_v51  ;;  %v603_v52 = vadd.f32 %v583_v46, %v563_v14 }
  0xc1   :  { %v594_v16 = vadd.f32 %v583_v46, %v554_v33  ;;  %v595_v20 = vadd.f32 %v583_v46, %v555_v17  ;;  %v644_v37 = vadd.f32 %v621_v25, %v620_v18  ;;  %v612_v55 = vmax.f32 %v596_v45, 0.0 }
  0xc2   :  { %627 = vadd.xlane.f32.xlu0 %v626_v3  ;;  %639 = vadd.xlane.f32.xlu1 %v638_v62  ;;  %v618_v15 = vmax.f32 %v602_v10, 0.0  ;;  %v619_v21 = vmax.f32 %v603_v52, 0.0  ;;  %v613_v24 = vmax.f32 %v597_v58, 0.0  ;;  %v661_v35 = vadd.s32 4294967288, %v656_v30 }
  0xc3   :  { %v610_v50 = vmax.f32 %v594_v16, 0.0  ;;  %v611_v54 = vmax.f32 %v595_v20, 0.0  ;;  %v668_v57 = vadd.s32 4294967280, %v656_v30  ;;  %v675_v34 = vadd.s32 4294967272, %v656_v30 }
  0xc4   :  { %v641_v53 = vadd.f32 %v619_v21, %v618_v15  ;;  %v632_v38 = vadd.f32 %v613_v24, %v612_v55  ;;  %v659_v59 = vsub.s32 %v656_v30, %v1835_v4  ;;  %v664_v63 = vsub.s32 %v661_v35, %v1835_v4 }
  0xc5   :  { %v629_v36 = vadd.f32 %v611_v54, %v610_v50  ;;  %v671_v26 = vsub.s32 %v668_v57, %v1835_v4  ;;  %v678_v9 = vsub.s32 %v675_v34, %v1835_v4 }
  0xc6   :  { %636 = vadd.xlane.f32.xlu0 %v635_v40  ;;  %642 = vadd.xlane.f32.xlu1 %v641_v53 }
  0xca   :  { %630 = vadd.xlane.f32.xlu0 %v629_v36  ;;  %645 = vadd.xlane.f32.xlu1 %v644_v37 }
  0xce   :  { %633 = vadd.xlane.f32.xlu0 %v632_v38 }
 0x146   :  { %v625_v29 = vpop.xlane.xlu1 %624 }
 0x147   :  { %v660_v60 = vrot.slane %v625_v29, %v659_v59 }
 0x14f   :  { %v628_v32 = vpop.xlane.xlu0 %627  ;;  %v640_v31 = vpop.xlane.xlu1 %639 }
 0x150   :  { %v665_v49 = vrot.slane %v628_v32, %v664_v63  ;;  %v689_v13 = vrot.slane %v640_v31, %v664_v63 }
 0x152   :  { %v667_v41 = vsel %vm666_vm1, %v665_v49, %v660_v60 }
 0x153   :  { %v637_v39 = vpop.xlane.xlu0 %636  ;;  %v643_v8 = vpop.xlane.xlu1 %642 }
 0x154   :  { %v685_v2 = vrot.slane %v637_v39, %v659_v59  ;;  %v694_v51 = vrot.slane %v643_v8, %v671_v26 }
 0x156   :  { %v690_v6 = vsel %vm666_vm1, %v689_v13, %v685_v2 }
 0x157   :  { %v631_v22 = vpop.xlane.xlu0 %630  ;;  %v646_v12 = vpop.xlane.xlu1 %645  ;;  %v695_v33 = vsel %vm673_vm2, %v694_v51, %v690_v6 }
 0x158   :  { %v672_v14 = vrot.slane %v631_v22, %v671_v26  ;;  %v699_v28 = vrot.slane %v646_v12, %v678_v9 }
 0x15a   :  { %v674_v17 = vsel %vm673_vm2, %v672_v14, %v667_v41  ;;  %v700_v42 = vsel %vm680_vm3, %v699_v28, %v695_v33 }
 0x15b   :  { %v634_v11 = vpop.xlane.xlu0 %633 }
 0x15c   :  { %v679_v27 = vrot.slane %v634_v11, %v678_v9 }
 0x15e   :  { %v681_v47 = vsel %vm680_vm3, %v679_v27, %v674_v17 }
 0x15f   :  { %v702_v5 = vsel %vm701_vm4, %v700_v42, %v681_v47 }
 0x160   :  { %v704_v48 = vadd.f32 %v702_v5, %v622_v19 }
 0x162   :  { %706 = vst.msk [vmem:[#allocation2] sm:$0x3] %vm55_vm0, %v704_v48 }
 0x163   :  { %1372 = dma.done.wait [#allocation8], 256 }
 0x164   :  { %1373 = vsyncadd [#allocation8], 4294967040 }
 0x165   :  { %1374 = dma.done.wait [#allocation8 + $0x1], 256 }
 0x166   :  { %1375 = vsyncadd [#allocation8 + $0x1], 4294967040 }
 0x167   :  { %1376 = dma.done.wait [#allocation8 + $0x2], 256 }
 0x168   :  { %1377 = vsyncadd [#allocation8 + $0x2], 4294967040 }
 0x169   :  { %1378 = dma.done.wait [#allocation8 + $0x3], 128 }
 0x16a   :  { %1379 = vsyncadd [#allocation8 + $0x3], 4294967168 }
 0x16b   :  { %1380 = dma.done.wait [#allocation8 + $0x4], 256 }
 0x16c   :  { %1381 = vsyncadd [#allocation8 + $0x4], 4294967040  ;;  %v1836_v7 = vmov 0.0   ;;  %v1837_v43 = vld [vmem:[#allocation25_spill] sm:$0xff]  ;;  %vm1391_vm5 = vmmov 0   ;;  %v1838_v44 = vld [vmem:[#allocation27_spill] sm:$0xff] }
 0x16d   :  { %1267 = vmatprep.subr.bf16.mxu0 %v1836_v7  ;;  %1275 = vmatprep.subr.bf16.mxu1 %v1836_v7  ;;  %v1839_v46 = vld [vmem:[#allocation26_spill] sm:$0xff]  ;;  %v1840_v61 = vld [vmem:[#allocation28_spill] sm:$0xff]  ;;  %vm733_vm6 = vcmask 261120   ;;  %v1841_v3 = vld [vmem:[#allocation29_spill] sm:$0xff]  ;;  %vm946_vm7 = vcmask 123904   ;;  %vm986_vm8 = vcmask 130048  }
 0x16e   :  { %1268 = vmatpush3.bf16.msra.mxu0 %v1837_v43  ;;  %1271 = vmatprep.mubr.msk.bf16.mxu0 %vm1391_vm5, %v1836_v7  ;;  %v728_v23 = vld [vmem:[#allocation2] sm:$0x3]  ;;  %v1842_v62 = vld [vmem:[#allocation30_spill] sm:$0xff]  ;;  %v1843_v63 = vld [vmem:[#allocation31_spill] sm:$0xff]  ;;  %s1392_s0 = smov [#allocation9]  }
 0x16f   :  { %1269 = vmatprep.subr.bf16.mxu0 %v1836_v7  ;;  %1276 = vmatpush3.bf16.msra.mxu1 %v1838_v44  ;;  %v729_v1 = vmul.f32 0.00390625, %v728_v23  ;;  %v1235_v35 = vld [vmem:[%s1792_s3] ss:$0 sm:$0xff]  ;;  %s1131_s19 = sshll.u32 %s1392_s0, 4  ;;  %s1132_s19 = int_to_ptr.vmem [resolvable:$true] %s1131_s19 }
 0x170   :  { %1277 = vmatprep.subr.bf16.mxu1 %v1836_v7  ;;  %1279 = vmatprep.mubr.msk.bf16.mxu1 %vm1391_vm5, %v1836_v7  ;;  %v1236_v34 = vld [vmem:[%s1793_s4] ss:$0 sm:$0xff]  ;;  %s1328_s16 = scalar_lea.vmem %s1132_s19, 32  ;;  %p1333_p1 = scmp.lt.s32.totalorder %s1132_s19, %s1132_s19 }
 0x171   :  { %v730_v0 = vpack.c.bf16 %v729_v1, %v729_v1  ;;  %v1239_v23 = vld [vmem:[%s1795_s6] ss:$0 sm:$0xff]  ;;  %p1329_p0 = scmp.ne.s32.totalorder %s1132_s19, %s1328_s16  ;;  %p1334_p2 = scmp.lt.s32.totalorder %s1328_s16, %s1328_s16 }
 0x172   :  { %1270 = vmatpush3.bf16.msra.mxu0 %v1839_v46  ;;  %v1238_v46 = vld [vmem:[%s1794_s5] ss:$0 sm:$0xff] }
 0x173   :  { %1278 = vmatpush3.bf16.msra.mxu1 %v1840_v61  ;;  %1283 = vmatprep.subr.bf16.mxu0 %v1836_v7  ;;  %p1335_p3 = por %p1334_p2, %p1333_p1 }
 0x174   :  { %1291 = vmatprep.subr.bf16.mxu1 %v1836_v7 }
 0x175   :  { %1272 = vmatmul.mubr.msk.bf16.vlgmr.msra.gmra.mrb[0].mxu0 %vm733_vm6, %v730_v0  ;;  %p1336_p4 = pnand %p1335_p3, %p1329_p0 }
 0x176   :  { %1284 = vmatpush3.bf16.msra.mxu0 %v1841_v3  ;;  %1287 = vmatprep.mubr.msk.bf16.mxu0 %vm1391_vm5, %v1836_v7 }
 0x177   :  { %1285 = vmatprep.subr.bf16.mxu0 %v1836_v7 }
 0x17a   :  { %1286 = vmatpush3.bf16.msra.mxu0 %v1842_v62 }
 0x17b   :  { %1297 = vmatprep.subr.bf16.mxu0 %v1836_v7 }
 0x248   :  { %v771_v10 = vpop.f32.mrb[0].mxu0 }
 0x249   :  { %v777_v52 = vsel %vm55_vm0, %v771_v10, 0.0  ;;  %v1273_v16 = vpop.f32.mrb[1].mxu0 }
 0x24a   :  { %v778_v20 = vrot.slane %v777_v52, 4  ;;  %v774_v15 = vpop.f32.mrb[2].mxu0 }
 0x24b   :  { %v1274_v21 = vpop.f32.mrb[3].mxu0 }
 0x24c   :  { %v779_v40 = vadd.f32 %v778_v20, %v777_v52  ;;  %v1845_v52 = vld [vmem:[#allocation33_spill] sm:$0xff] }
 0x24e   :  { %v780_v18 = vrot.slane %v779_v40, 2 }
 0x250   :  { %v781_v25 = vadd.f32 %v780_v18, %v779_v40 }
 0x252   :  { %v782_v45 = vrot.slane %v781_v25, 1 }
 0x254   :  { %v783_v53 = vadd.f32 %v782_v45, %v781_v25 }
 0x256   :  { %v785_v50 = vmul.f32 0.5, %v783_v53 }
 0x258   :  { %v786_v54 = vsub.f32 %v771_v10, %v785_v50  ;;  %v1844_v10 = vld [vmem:[#allocation32_spill] sm:$0xff] }
 0x25a   :  { %v787_v58 = vmul.f32 %v786_v54, %v786_v54 }
 0x25c   :  { %v788_v36 = vsel %vm55_vm0, %v787_v58, 0.0 }
 0x25d   :  { %v789_v37 = vrot.slane %v788_v36, 4 }
 0x25f   :  { %v790_v55 = vadd.f32 %v789_v37, %v788_v36 }
 0x261   :  { %v791_v24 = vrot.slane %v790_v55, 2 }
 0x263   :  { %v792_v38 = vadd.f32 %v791_v24, %v790_v55 }
 0x265   :  { %v793_v29 = vrot.slane %v792_v38, 1 }
 0x267   :  { %v794_v56 = vadd.f32 %v793_v29, %v792_v38 }
 0x269   :  { %v795_v30 = vmul.f32 0.5, %v794_v56 }
 0x26b   :  { %v796_v32 = vadd.f32 1e-05, %v795_v30 }
 0x26d   :  { %1320 = vrsqrt.f32 %v796_v32 }
 0x277   :  { %v1321_v31 = vpop.eup %1320 }
 0x278   :  { %v798_v57 = vmul.f32 %v1321_v31, %v786_v54 }
 0x27a   :  { %v806_v39 = vmul.f32 %v1235_v35, %v798_v57  ;;  %v1241_v57 = vld [vmem:[%s1796_s7] ss:$0 sm:$0xff] }
 0x27c   :  { %v814_v8 = vadd.f32 %v1236_v34, %v806_v39  ;;  %v1242_v39 = vld [vmem:[%s1797_s8] ss:$0 sm:$0xff] }
 0x27e   :  { %v815_v4 = vmax.f32 %v814_v8, 0.0 }
 0x280   :  { %v816_v59 = vpack.c.bf16 %v815_v4, %v815_v4 }
 0x282   :  { %1280 = vmatmul.mubr.msk.bf16.vlgmr.msra.gmra.mrb[0].mxu1 %vm733_vm6, %v816_v59 }
 0x283   :  { %1292 = vmatpush3.bf16.msra.mxu1 %v1843_v63  ;;  %1293 = vmatprep.mubr.msk.bf16.mxu1 %vm1391_vm5, %v1836_v7 }
 0x355   :  { %v856_v26 = vpop.f32.mrb[0].mxu1 }
 0x356   :  { %v862_v2 = vsel %vm55_vm0, %v856_v26, 0.0  ;;  %v1281_v9 = vpop.f32.mrb[1].mxu1 }
 0x357   :  { %v863_v22 = vrot.slane %v862_v2, 4  ;;  %v859_v12 = vpop.f32.mrb[2].mxu1 }
 0x358   :  { %v1282_v49 = vpop.f32.mrb[3].mxu1 }
 0x359   :  { %v864_v13 = vadd.f32 %v863_v22, %v862_v2 }
 0x35b   :  { %v865_v51 = vrot.slane %v864_v13, 2 }
 0x35d   :  { %v866_v14 = vadd.f32 %v865_v51, %v864_v13 }
 0x35f   :  { %v867_v60 = vrot.slane %v866_v14, 1 }
 0x361   :  { %v868_v6 = vadd.f32 %v867_v60, %v866_v14 }
 0x363   :  { %v869_v28 = vmul.f32 0.5, %v868_v6 }
 0x365   :  { %v870_v11 = vsub.f32 %v856_v26, %v869_v28 }
 0x367   :  { %v871_v41 = vmul.f32 %v870_v11, %v870_v11 }
 0x369   :  { %v872_v27 = vsel %vm55_vm0, %v871_v41, 0.0 }
 0x36a   :  { %v873_v33 = vrot.slane %v872_v27, 4 }
 0x36c   :  { %v874_v17 = vadd.f32 %v873_v33, %v872_v27 }
 0x36e   :  { %v875_v19 = vrot.slane %v874_v17, 2 }
 0x370   :  { %v876_v42 = vadd.f32 %v875_v19, %v874_v17 }
 0x372   :  { %v877_v47 = vrot.slane %v876_v42, 1 }
 0x374   :  { %v878_v5 = vadd.f32 %v877_v47, %v876_v42 }
 0x376   :  { %v879_v48 = vmul.f32 0.5, %v878_v5 }
 0x378   :  { %v880_v43 = vadd.f32 1e-05, %v879_v48 }
 0x37a   :  { %1322 = vrsqrt.f32 %v880_v43 }
 0x384   :  { %v1323_v44 = vpop.eup %1322 }
 0x385   :  { %v882_v61 = vmul.f32 %v1323_v44, %v870_v11 }
 0x387   :  { %v890_v1 = vmul.f32 %v1238_v46, %v882_v61  ;;  %v1244_v46 = vld [vmem:[%s1798_s9] ss:$0 sm:$0xff] }
 0x389   :  { %v898_v0 = vadd.f32 %v1239_v23, %v890_v1  ;;  %v1245_v23 = vld [vmem:[%s1799_s10] ss:$0 sm:$0xff] }
 0x38b   :  { %v899_v3 = vmax.f32 %v898_v0, 0.0 }
 0x38d   :  { %v900_v62 = vpack.c.bf16 %v899_v3, %v899_v3 }
 0x38f   :  { %1288 = vmatmul.mubr.msk.bf16.vlgmr.msra.gmra.mrb[4].mxu0 %vm733_vm6, %v900_v62 }
 0x390   :  { %1298 = vmatpush3.bf16.msra.mxu0 %v1844_v10  ;;  %1301 = vmatprep.mubr.msk.bf16.mxu0 %vm1391_vm5, %v1836_v7 }
 0x391   :  { %1299 = vmatprep.subr.bf16.mxu0 %v1836_v7 }
 0x394   :  { %1300 = vmatpush3.bf16.msra.mxu0 %v1845_v52 }
 0x462   :  { %v940_v16 = vpop.f32.mrb[4].mxu0 }
 0x463   :  { %v947_v20 = vsel %vm946_vm7, %v940_v16, 0.0  ;;  %v1289_v15 = vpop.f32.mrb[5].mxu0 }
 0x464   :  { %v948_v21 = vrot.slane %v947_v20, 4  ;;  %v943_v40 = vpop.f32.mrb[6].mxu0 }
 0x465   :  { %v1290_v18 = vpop.f32.mrb[7].mxu0 }
 0x466   :  { %v949_v25 = vadd.f32 %v948_v21, %v947_v20 }
 0x468   :  { %v950_v45 = vrot.slane %v949_v25, 2 }
 0x46a   :  { %v951_v53 = vadd.f32 %v950_v45, %v949_v25 }
 0x46c   :  { %v952_v50 = vrot.slane %v951_v53, 1 }
 0x46e   :  { %v953_v54 = vadd.f32 %v952_v50, %v951_v53 }
 0x470   :  { %v954_v58 = vmul.f32 0.5, %v953_v54 }
 0x472   :  { %v955_v36 = vsub.f32 %v940_v16, %v954_v58 }
 0x474   :  { %v956_v37 = vmul.f32 %v955_v36, %v955_v36 }
 0x476   :  { %v957_v55 = vsel %vm946_vm7, %v956_v37, 0.0 }
 0x477   :  { %v958_v24 = vrot.slane %v957_v55, 4 }
 0x479   :  { %v959_v7 = vadd.f32 %v958_v24, %v957_v55 }
 0x47b   :  { %v960_v38 = vrot.slane %v959_v7, 2 }
 0x47d   :  { %v961_v29 = vadd.f32 %v960_v38, %v959_v7 }
 0x47f   :  { %v962_v56 = vrot.slane %v961_v29, 1 }
 0x481   :  { %v963_v30 = vadd.f32 %v962_v56, %v961_v29 }
 0x483   :  { %v964_v32 = vmul.f32 0.5, %v963_v30 }
 0x485   :  { %v965_v31 = vadd.f32 1e-05, %v964_v32 }
 0x487   :  { %1324 = vrsqrt.f32 %v965_v31 }
 0x491   :  { %v1325_v35 = vpop.eup %1324 }
 0x492   :  { %v967_v34 = vmul.f32 %v1325_v35, %v955_v36 }
 0x494   :  { %v975_v8 = vmul.f32 %v1241_v57, %v967_v34 }
 0x496   :  { %v983_v4 = vadd.f32 %v1242_v39, %v975_v8 }
 0x498   :  { %v984_v59 = vpack.c.bf16 %v983_v4, %v983_v4  ;;  %v1121_v63 = vsel %vm986_vm8, %v983_v4, 0.0 }
 0x499   :  { %1123 = vst [vmem:[#allocation9] sm:$0x3] %v1121_v63 }
 0x49a   :  { %1294 = vmatmul.mubr.msk.bf16.vlgmr.msra.gmra.mrb[4].mxu1 %vm986_vm8, %v984_v59 }
 0x56d   :  { %v1024_v26 = vpop.f32.mrb[4].mxu1 }
 0x56e   :  { %v1030_v2 = vsel %vm55_vm0, %v1024_v26, 0.0  ;;  %v1295_v9 = vpop.f32.mrb[5].mxu1 }
 0x56f   :  { %v1031_v22 = vrot.slane %v1030_v2, 4  ;;  %v1027_v12 = vpop.f32.mrb[6].mxu1 }
 0x570   :  { %v1296_v49 = vpop.f32.mrb[7].mxu1 }
 0x571   :  { %v1032_v13 = vadd.f32 %v1031_v22, %v1030_v2 }
 0x573   :  { %v1033_v51 = vrot.slane %v1032_v13, 2 }
 0x575   :  { %v1034_v14 = vadd.f32 %v1033_v51, %v1032_v13 }
 0x577   :  { %v1035_v60 = vrot.slane %v1034_v14, 1 }
 0x579   :  { %v1036_v6 = vadd.f32 %v1035_v60, %v1034_v14 }
 0x57b   :  { %v1037_v28 = vmul.f32 0.5, %v1036_v6 }
 0x57d   :  { %v1038_v11 = vsub.f32 %v1024_v26, %v1037_v28 }
 0x57f   :  { %v1039_v41 = vmul.f32 %v1038_v11, %v1038_v11 }
 0x581   :  { %v1040_v27 = vsel %vm55_vm0, %v1039_v41, 0.0 }
 0x582   :  { %v1041_v33 = vrot.slane %v1040_v27, 4 }
 0x584   :  { %v1042_v17 = vadd.f32 %v1041_v33, %v1040_v27 }
 0x586   :  { %v1043_v19 = vrot.slane %v1042_v17, 2 }
 0x588   :  { %v1044_v42 = vadd.f32 %v1043_v19, %v1042_v17 }
 0x58a   :  { %v1045_v47 = vrot.slane %v1044_v42, 1 }
 0x58c   :  { %v1046_v5 = vadd.f32 %v1045_v47, %v1044_v42 }
 0x58e   :  { %v1047_v48 = vmul.f32 0.5, %v1046_v5 }
 0x590   :  { %v1048_v43 = vadd.f32 1e-05, %v1047_v48 }
 0x592   :  { %1326 = vrsqrt.f32 %v1048_v43 }
 0x59c   :  { %v1327_v44 = vpop.eup %1326 }
 0x59d   :  { %v1050_v61 = vmul.f32 %v1327_v44, %v1038_v11 }
 0x59f   :  { %v1058_v1 = vmul.f32 %v1244_v46, %v1050_v61 }
 0x5a1   :  { %v1066_v0 = vadd.f32 %v1245_v23, %v1058_v1 }
 0x5a3   :  { %v1067_v3 = vmax.f32 %v1066_v0, 0.0 }
 0x5a5   :  { %v1068_v62 = vpack.c.bf16 %v1067_v3, %v1067_v3 }
 0x5a7   :  { %1302 = vmatmul.mubr.msk.bf16.vlgmr.msra.gmra.mrb[8].mxu0 %vm733_vm6, %v1068_v62 }
 0x5a8   :  { %1339 = shalt.err (!%p1336_p4)
}
 0x5a9   :  { %s1340_s10 = scalar_lea.hbm %s1806_s17, 32 }
 0x5aa   :  { %p1341_p5 = scmp.ne.s32.totalorder %s1806_s17, %s1340_s10  ;;  %p1344_p6 = scmp.lt.u32.totalorder %s1340_s10, %s1806_s17 }
 0x5ac   :  { %p1346_p7 = pnand %p1344_p6, %p1341_p5 }
 0x5ae   :  { %1349 = shalt.err (!%p1346_p7)
}
 0x5af   :  { %1134 = dma.vmem_to_hbm [thread:$0]  %s1132_s19, 32, %s1806_s17, [#allocation10]   ;;  %v1246_v10 = vld [vmem:[%s1800_s11] ss:$0 sm:$0xff] }
 0x5b0   :  { %s1393_s25 = smov [#allocation11]  }
 0x5b1   :  { %s1141_s26 = sshll.u32 %s1393_s25, 4  ;;  %s1142_s26 = int_to_ptr.vmem [resolvable:$true] %s1141_s26 }
 0x5b2   :  { %s1350_s3 = scalar_lea.vmem %s1142_s26, 32  ;;  %p1355_p9 = scmp.lt.s32.totalorder %s1142_s26, %s1142_s26 }
 0x5b3   :  { %p1351_p8 = scmp.ne.s32.totalorder %s1142_s26, %s1350_s3  ;;  %p1356_p10 = scmp.lt.s32.totalorder %s1350_s3, %s1350_s3 }
 0x5b5   :  { %p1357_p11 = por %p1356_p10, %p1355_p9 }
 0x5b7   :  { %p1358_p12 = pnand %p1357_p11, %p1351_p8 }
 0x67a   :  { %v1115_v52 = vpop.f32.mrb[8].mxu0 }
 0x67b   :  { %v1116_v16 = vadd.f32 %v1246_v10, %v1115_v52  ;;  %v1303_v20 = vpop.f32.mrb[9].mxu0 }
 0x67c   :  { %v1118_v15 = vpop.f32.mrb[10].mxu0 }
 0x67d   :  { %v1122_v21 = vsel %vm986_vm8, %v1116_v16, 0.0  ;;  %v1304_v40 = vpop.f32.mrb[11].mxu0 }
 0x67e   :  { %1124 = vst [vmem:[#allocation11] sm:$0x3] %v1122_v21 }
 0x67f   :  { %1361 = shalt.err (!%p1358_p12)
}
 0x680   :  { %s1362_s4 = scalar_lea.hbm %s1807_s18, 32 }
 0x681   :  { %p1363_p13 = scmp.ne.s32.totalorder %s1807_s18, %s1362_s4  ;;  %p1366_p0 = scmp.lt.u32.totalorder %s1362_s4, %s1807_s18 }
 0x683   :  { %p1368_p1 = pnand %p1366_p0, %p1363_p13 }
 0x685   :  { %1371 = shalt.err (!%p1368_p1)
}
 0x686   :  { %1144 = dma.vmem_to_hbm [thread:$0]  %s1142_s26, 32, %s1807_s18, [#allocation12]  }
 0x687   :  { %1382 = dma.done.wait [#allocation10], 32  }
 0x688   :  { %1383 = vsyncadd [#allocation10], 4294967264 }
 0x689   :  { %1384 = dma.done.wait [#allocation12], 32  }
 0x68a   :  { %1385 = vsyncadd [#allocation12], 4294967264 }
 0x68b   :  { %1151 = vsyncpa [#allocation10], 1 }
 0x68c   :  { %1152 = vsyncpa [#allocation12], 1 }
 0x68d   :  { %1153 = vsyncmov [#allocation8] }
 0x690   :  { %s1154_s7 = vpop.sfrf %1153 }
 0x691   :  { %p1248_p2 = scmp.ne.s32.totalorder %s1154_s7, 0 }
 0x693   :  { %1158 = shalt.err (%p1248_p2)  }
 0x694   :  { %1160 = vsyncmov [#allocation8 + $0x1] }
 0x697   :  { %s1161_s8 = vpop.sfrf %1160 }
 0x698   :  { %p1249_p3 = scmp.ne.s32.totalorder %s1161_s8, 0 }
 0x69a   :  { %1165 = shalt.err (%p1249_p3)  }
 0x69b   :  { %1167 = vsyncmov [#allocation8 + $0x2] }
 0x69e   :  { %s1168_s15 = vpop.sfrf %1167 }
 0x69f   :  { %p1250_p4 = scmp.ne.s32.totalorder %s1168_s15, 0 }
 0x6a1   :  { %1172 = shalt.err (%p1250_p4)  }
 0x6a2   :  { %1174 = vsyncmov [#allocation8 + $0x3] }
 0x6a5   :  { %s1175_s18 = vpop.sfrf %1174 }
 0x6a6   :  { %p1251_p5 = scmp.ne.s32.totalorder %s1175_s18, 0 }
 0x6a8   :  { %1179 = shalt.err (%p1251_p5)  }
 0x6a9   :  { %1181 = vsyncmov [#allocation8 + $0x4] }
 0x6ac   :  { %s1182_s30 = vpop.sfrf %1181 }
 0x6ad   :  { %p1252_p6 = scmp.ne.s32.totalorder %s1182_s30, 0 }
 0x6af   :  { %1186 = shalt.err (%p1252_p6)  }

</bundles_post_ra>
